<compile_context>
chip_gen: v7x
topology: tpu7x:2x2x1
jax: 0.10.0
libtpu: 0.0.40
codegen_flags: <defaults>
</compile_context>

<pallas_src>
import functools

import jax
import jax.numpy as jnp
from jax.experimental import pallas as pl
from jax.experimental.pallas import tpu as pltpu


# ----------------------------------------------------------------------------
# Fused forward kernel (built for static num_layers / T / B / H).
# ----------------------------------------------------------------------------
def make_fused_kernel(num_layers, T, B, H):
    def kernel(*refs):
        # inputs: x_flat, then 3 refs per LSTM layer, then 8 head refs.
        x_ref = refs[0]                                  # (T*B, I), time-major rows: t*B + b
        lw = refs[1:1 + 3 * num_layers]                  # per layer: w_ih(I,4H), w_hh(H,4H), b(1,4H)
        (w1_ref, b1_ref, w2_ref, b2_ref,
         wf1_ref, bf1_ref, wf2_ref, bf2_ref) = refs[1 + 3 * num_layers:9 + 3 * num_layers]
        out_ref = refs[9 + 3 * num_layers]               # (B, C)
        xw_sc = refs[10 + 3 * num_layers]                # VMEM (T*B, 4H) pre-projected gates
        seq_sc = refs[11 + 3 * num_layers]               # VMEM (T*B, H) layer output sequence

        hs = []
        for layer in range(num_layers):
            wih = lw[3 * layer][...]                     # (I_layer, 4H)
            whh = lw[3 * layer + 1][...]                 # (H, 4H)
            bias = lw[3 * layer + 2][...]                # (1, 4H)  (= b_ih + b_hh)
            inp = x_ref[...] if layer == 0 else seq_sc[...]
            # Hoisted input projection: one (T*B, I) @ (I, 4H) MXU pass per layer.
            xw_sc[...] = jnp.dot(inp, wih, preferred_element_type=jnp.float32) + bias

            h = jnp.zeros((B, H), jnp.float32)
            c = jnp.zeros((B, H), jnp.float32)
            hs = []
            for t in range(T):     # serial recurrence, fully unrolled (T static & small)
                gates = xw_sc[t * B:(t + 1) * B, :] + jnp.dot(
                    h, whh, preferred_element_type=jnp.float32)        # (B, 4H)
                i_g = jax.nn.sigmoid(gates[:, 0 * H:1 * H])
                f_g = jax.nn.sigmoid(gates[:, 1 * H:2 * H])
                g_g = jnp.tanh(gates[:, 2 * H:3 * H])
                o_g = jax.nn.sigmoid(gates[:, 3 * H:4 * H])
                c = f_g * c + i_g * g_g
                h = o_g * jnp.tanh(c)
                seq_sc[t * B:(t + 1) * B, :] = h
                hs.append(h)
            # Inter-layer dropout is identity at inference.

        # ---- temporal attention: score matmuls on the MXU, softmax unrolled ----
        seq = seq_sc[...]                                              # (T*B, H), last layer
        s = jnp.tanh(jnp.dot(seq, w1_ref[...],
                             preferred_element_type=jnp.float32) + b1_ref[...])    # (T*B, H//2)
        scores = (jnp.dot(s, w2_ref[...],
                          preferred_element_type=jnp.float32) + b2_ref[...])       # (T*B, 1) value

        sc_t = [scores[t * B:(t + 1) * B, :] for t in range(T)]        # each (B, 1)
        m = sc_t[0]
        for t in range(1, T):
            m = jnp.maximum(m, sc_t[t])
        e_t = [jnp.exp(v - m) for v in sc_t]
        denom = e_t[0]
        for t in range(1, T):
            denom = denom + e_t[t]
        inv = 1.0 / denom                                              # (B, 1)

        context = hs[0] * (e_t[0] * inv)
        for t in range(1, T):
            context = context + hs[t] * (e_t[t] * inv)                 # (B, H)

        # ---- fc head (dropout = identity at inference) ----
        h1 = jnp.maximum(
            jnp.dot(context, wf1_ref[...], preferred_element_type=jnp.float32)
            + bf1_ref[...], 0.0)
        out_ref[...] = (jnp.dot(h1, wf2_ref[...], preferred_element_type=jnp.float32)
                        + bf2_ref[...])

    return kernel


def _zeros_index_map(nd, i):
    return (0,) * nd


def _full_spec(a):
    return pl.BlockSpec(a.shape, functools.partial(_zeros_index_map, a.ndim))


# ----------------------------------------------------------------------------
# Wrapper: one pallas_call, everything VMEM-resident.
# ----------------------------------------------------------------------------
@jax.jit
def skeleton_lstm_forward(x, params):
    # x: (B, T, input_size), batch-first like the PyTorch module.
    x = x.astype(jnp.float32)
    B, T, I = x.shape
    lstm = params["lstm"]
    head = params["head"]
    num_layers = len(lstm)
    H = lstm[0][1].shape[0]
    C = head[6].shape[-1]

    # Flatten to time-major rows (row index = t*B + b) once, outside the kernel.
    x_flat = jnp.transpose(x, (1, 0, 2)).reshape(T * B, I)

    flat_lstm = [w for layer in lstm for w in layer]
    ins = (x_flat, *flat_lstm, *head)
    in_specs = [_full_spec(a) for a in ins]

    return pl.pallas_call(
        make_fused_kernel(num_layers, T, B, H),
        out_shape=jax.ShapeDtypeStruct((B, C), jnp.float32),
        grid_spec=pltpu.PrefetchScalarGridSpec(
            num_scalar_prefetch=0,
            grid=(1,),
            in_specs=in_specs,
            out_specs=pl.BlockSpec((B, C), lambda i: (0, 0)),
            scratch_shapes=[pltpu.VMEM((T * B, 4 * H), jnp.float32),   # pre-projected gates
                            pltpu.VMEM((T * B, H), jnp.float32)],      # layer output sequence
        ),
        compiler_params=pltpu.CompilerParams(
            dimension_semantics=("arbitrary",)),
    )(*ins)


# ----------------------------------------------------------------------------
# Parameter init (deterministic, PyTorch-like uniform ranges).
# ----------------------------------------------------------------------------
def init_params(key, input_size, hidden_size, num_layers, num_classes):
    H, Hh = hidden_size, hidden_size // 2

    def unif(k, shape, fan_in):
        s = 1.0 / jnp.sqrt(jnp.float32(fan_in))
        return jax.random.uniform(k, shape, jnp.float32, -s, s)

    keys = iter(jax.random.split(key, 6 * num_layers + 8))
    lstm = []
    for layer in range(num_layers):
        I = input_size if layer == 0 else H
        w_ih = unif(next(keys), (4 * H, I), H)
        w_hh = unif(next(keys), (4 * H, H), H)
        b_ih = unif(next(keys), (4 * H,), H)
        b_hh = unif(next(keys), (4 * H,), H)
        lstm.append((w_ih.T, w_hh.T, (b_ih + b_hh).reshape(1, 4 * H)))

    w1 = unif(next(keys), (H, Hh), H)
    b1 = unif(next(keys), (1, Hh), H)
    w2 = unif(next(keys), (Hh, 1), Hh)        # Linear(Hh -> 1) weight, stored transposed
    b2 = unif(next(keys), (1, 1), Hh)
    wf1 = unif(next(keys), (H, Hh), H)
    bf1 = unif(next(keys), (1, Hh), H)
    wf2 = unif(next(keys), (Hh, num_classes), Hh)
    bf2 = unif(next(keys), (1, num_classes), Hh)
    head = (w1, b1, w2, b2, wf1, bf1, wf2, bf2)
    return {"lstm": lstm, "head": head}


# ----------------------------------------------------------------------------
# Pure-JAX reference (for correctness check).
# ----------------------------------------------------------------------------
def reference_forward(x, params):
    h = x.astype(jnp.float32)
    for (wih_t, whh_t, b) in params["lstm"]:
        B, T, _ = h.shape
        Hd = whh_t.shape[0]

        def step(carry, x_t, wih_t=wih_t, whh_t=whh_t, b=b, Hd=Hd):
            hp, cp = carry
            gates = x_t @ wih_t + hp @ whh_t + b[0]
            i = jax.nn.sigmoid(gates[:, :Hd])
            f = jax.nn.sigmoid(gates[:, Hd:2 * Hd])
            g = jnp.tanh(gates[:, 2 * Hd:3 * Hd])
            o = jax.nn.sigmoid(gates[:, 3 * Hd:])
            c = f * cp + i * g
            hn = o * jnp.tanh(c)
            return (hn, c), hn

        xs = jnp.transpose(h, (1, 0, 2))
        (_, _), ys = jax.lax.scan(step, (jnp.zeros((B, Hd)), jnp.zeros((B, Hd))), xs)
        h = jnp.transpose(ys, (1, 0, 2))

    w1, b1, w2, b2, wf1, bf1, wf2, bf2 = params["head"]
    s = jnp.tanh(h @ w1 + b1)
    scores = s @ w2 + b2[0, 0]                    # (B, T, 1)
    attn = jax.nn.softmax(scores, axis=1)
    context = jnp.sum(h * attn, axis=1)
    h1 = jax.nn.relu(context @ wf1 + bf1)
    return h1 @ wf2 + bf2


if __name__ == "__main__":
    B, T = 2, 8
    input_size = 34          # 17 keypoints x 2
    hidden_size = 32
    num_layers = 2
    num_classes = 8

    key = jax.random.PRNGKey(0)
    kx, kp = jax.random.split(key)
    x = jax.random.normal(kx, (B, T, input_size), dtype=jnp.float32)
    params = init_params(kp, input_size, hidden_size, num_layers, num_classes)

    out = jax.block_until_ready(skeleton_lstm_forward(x, params))
    ref = jax.block_until_ready(reference_forward(x, params))

    assert out.shape == (B, num_classes)
    assert jnp.allclose(out, ref, atol=1e-4, rtol=1e-4), (out, ref)
    print("KERNEL_OK")
</pallas_src>

<mosaic_0001>
module attributes {stable_mosaic.version = 11 : i64} {
  func.func @kernel(%arg0: i32, %arg1: memref<16x34xf32, #tpu.memory_space<vmem>>, %arg2: memref<34x128xf32, #tpu.memory_space<vmem>>, %arg3: memref<32x128xf32, #tpu.memory_space<vmem>>, %arg4: memref<1x128xf32, #tpu.memory_space<vmem>>, %arg5: memref<32x128xf32, #tpu.memory_space<vmem>>, %arg6: memref<32x128xf32, #tpu.memory_space<vmem>>, %arg7: memref<1x128xf32, #tpu.memory_space<vmem>>, %arg8: memref<32x16xf32, #tpu.memory_space<vmem>>, %arg9: memref<1x16xf32, #tpu.memory_space<vmem>>, %arg10: memref<16x1xf32, #tpu.memory_space<vmem>>, %arg11: memref<1x1xf32, #tpu.memory_space<vmem>>, %arg12: memref<32x16xf32, #tpu.memory_space<vmem>>, %arg13: memref<1x16xf32, #tpu.memory_space<vmem>>, %arg14: memref<16x8xf32, #tpu.memory_space<vmem>>, %arg15: memref<1x8xf32, #tpu.memory_space<vmem>>, %arg16: memref<2x8xf32, #tpu.memory_space<vmem>>, %arg17: memref<16x128xf32, #tpu.memory_space<vmem>>, %arg18: memref<16x32xf32, #tpu.memory_space<vmem>>) attributes {dimension_semantics = [#tpu.dimension_semantics<arbitrary>], iteration_bounds = array<i64: 1>, scalar_prefetch = 0 : i64, scratch_operands = 2 : i64, tpu.core_type = #tpu.core_type<tc>, window_params = [{pipeline_mode = #tpu.pipeline_mode<synchronous>, transform_indices = @transform_0, window_bounds = array<i64: 16, 34>}, {pipeline_mode = #tpu.pipeline_mode<synchronous>, transform_indices = @transform_1, window_bounds = array<i64: 34, 128>}, {pipeline_mode = #tpu.pipeline_mode<synchronous>, transform_indices = @transform_2, window_bounds = array<i64: 32, 128>}, {pipeline_mode = #tpu.pipeline_mode<synchronous>, transform_indices = @transform_3, window_bounds = array<i64: 1, 128>}, {pipeline_mode = #tpu.pipeline_mode<synchronous>, transform_indices = @transform_4, window_bounds = array<i64: 32, 128>}, {pipeline_mode = #tpu.pipeline_mode<synchronous>, transform_indices = @transform_5, window_bounds = array<i64: 32, 128>}, {pipeline_mode = #tpu.pipeline_mode<synchronous>, transform_indices = @transform_6, window_bounds = array<i64: 1, 128>}, {pipeline_mode = #tpu.pipeline_mode<synchronous>, transform_indices = @transform_7, window_bounds = array<i64: 32, 16>}, {pipeline_mode = #tpu.pipeline_mode<synchronous>, transform_indices = @transform_8, window_bounds = array<i64: 1, 16>}, {pipeline_mode = #tpu.pipeline_mode<synchronous>, transform_indices = @transform_9, window_bounds = array<i64: 16, 1>}, {pipeline_mode = #tpu.pipeline_mode<synchronous>, transform_indices = @transform_10, window_bounds = array<i64: 1, 1>}, {pipeline_mode = #tpu.pipeline_mode<synchronous>, transform_indices = @transform_11, window_bounds = array<i64: 32, 16>}, {pipeline_mode = #tpu.pipeline_mode<synchronous>, transform_indices = @transform_12, window_bounds = array<i64: 1, 16>}, {pipeline_mode = #tpu.pipeline_mode<synchronous>, transform_indices = @transform_13, window_bounds = array<i64: 16, 8>}, {pipeline_mode = #tpu.pipeline_mode<synchronous>, transform_indices = @transform_14, window_bounds = array<i64: 1, 8>}, {pipeline_mode = #tpu.pipeline_mode<synchronous>, transform_indices = @transform_15, window_bounds = array<i64: 2, 8>}]} {
    %c0 = arith.constant 0 : index
    %c0_0 = arith.constant 0 : index
    %0 = vector.load %arg2[%c0, %c0_0] : memref<34x128xf32, #tpu.memory_space<vmem>>, vector<34x128xf32>
    %c0_1 = arith.constant 0 : index
    %c0_2 = arith.constant 0 : index
    %1 = vector.load %arg3[%c0_1, %c0_2] : memref<32x128xf32, #tpu.memory_space<vmem>>, vector<32x128xf32>
    %c0_3 = arith.constant 0 : index
    %c0_4 = arith.constant 0 : index
    %2 = vector.load %arg4[%c0_3, %c0_4] : memref<1x128xf32, #tpu.memory_space<vmem>>, vector<1x128xf32>
    %c0_5 = arith.constant 0 : index
    %c0_6 = arith.constant 0 : index
    %3 = vector.load %arg1[%c0_5, %c0_6] : memref<16x34xf32, #tpu.memory_space<vmem>>, vector<16x34xf32>
    %cst = arith.constant dense<0.000000e+00> : vector<16x128xf32>
    %4 = tpu.matmul %3, %0, %cst {dimension_numbers = #tpu.dot_dimension_numbers<[1], [0], [0], [1], [0, 0, 1, 1], [], []>} : vector<16x34xf32>, vector<34x128xf32>, vector<16x128xf32> -> vector<16x128xf32>
    %5 = vector.broadcast %2 : vector<1x128xf32> to vector<16x128xf32>
    %6 = arith.addf %4, %5 : vector<16x128xf32>
    %c0_7 = arith.constant 0 : index
    %c0_8 = arith.constant 0 : index
    %7 = vector.load %arg17[%c0_7, %c0_8] : memref<16x128xf32, #tpu.memory_space<vmem>>, vector<16x128xf32>
    tpu.vector_store %arg17[%c0_7, %c0_8], %6 {strides = array<i32>} : memref<16x128xf32, #tpu.memory_space<vmem>>, vector<16x128xf32>,
    %cst_9 = arith.constant 0.000000e+00 : f32
    %8 = vector.broadcast %cst_9 : f32 to vector<2x32xf32>
    %cst_10 = arith.constant 0.000000e+00 : f32
    %9 = vector.broadcast %cst_10 : f32 to vector<2x32xf32>
    %c0_11 = arith.constant 0 : index
    %c0_12 = arith.constant 0 : index
    %10 = vector.load %arg17[%c0_11, %c0_12] : memref<16x128xf32, #tpu.memory_space<vmem>>, vector<2x128xf32>
    %cst_13 = arith.constant dense<0.000000e+00> : vector<2x128xf32>
    %11 = tpu.matmul %8, %1, %cst_13 {dimension_numbers = #tpu.dot_dimension_numbers<[1], [0], [0], [1], [0, 0, 1, 1], [], []>} : vector<2x32xf32>, vector<32x128xf32>, vector<2x128xf32> -> vector<2x128xf32>
    %12 = arith.addf %10, %11 : vector<2x128xf32>
    %13 = vector.extract_strided_slice %12 {offsets = [0, 0], sizes = [2, 32], strides = [1, 1]} : vector<2x128xf32> to vector<2x32xf32>
    %14 = arith.negf %13 : vector<2x32xf32>
    %15 = math.exp %14 : vector<2x32xf32>
    %cst_14 = arith.constant 1.000000e+00 : f32
    %16 = vector.broadcast %cst_14 : f32 to vector<2x32xf32>
    %17 = arith.addf %16, %15 : vector<2x32xf32>
    %18 = arith.divf %16, %17 : vector<2x32xf32>
    %19 = vector.extract_strided_slice %12 {offsets = [0, 32], sizes = [2, 32], strides = [1, 1]} : vector<2x128xf32> to vector<2x32xf32>
    %20 = arith.negf %19 : vector<2x32xf32>
    %21 = math.exp %20 : vector<2x32xf32>
    %cst_15 = arith.constant 1.000000e+00 : f32
    %22 = vector.broadcast %cst_15 : f32 to vector<2x32xf32>
    %23 = arith.addf %22, %21 : vector<2x32xf32>
    %24 = arith.divf %22, %23 : vector<2x32xf32>
    %25 = vector.extract_strided_slice %12 {offsets = [0, 64], sizes = [2, 32], strides = [1, 1]} : vector<2x128xf32> to vector<2x32xf32>
    %26 = math.tanh %25 : vector<2x32xf32>
    %27 = vector.extract_strided_slice %12 {offsets = [0, 96], sizes = [2, 32], strides = [1, 1]} : vector<2x128xf32> to vector<2x32xf32>
    %28 = arith.negf %27 : vector<2x32xf32>
    %29 = math.exp %28 : vector<2x32xf32>
    %cst_16 = arith.constant 1.000000e+00 : f32
    %30 = vector.broadcast %cst_16 : f32 to vector<2x32xf32>
    %31 = arith.addf %30, %29 : vector<2x32xf32>
    %32 = arith.divf %30, %31 : vector<2x32xf32>
    %33 = arith.mulf %24, %9 : vector<2x32xf32>
    %34 = arith.mulf %18, %26 : vector<2x32xf32>
    %35 = arith.addf %33, %34 : vector<2x32xf32>
    %36 = math.tanh %35 : vector<2x32xf32>
    %37 = arith.mulf %32, %36 : vector<2x32xf32>
    %c0_17 = arith.constant 0 : index
    %c0_18 = arith.constant 0 : index
    %38 = vector.load %arg18[%c0_17, %c0_18] : memref<16x32xf32, #tpu.memory_space<vmem>>, vector<2x32xf32>
    tpu.vector_store %arg18[%c0_17, %c0_18], %37 {strides = array<i32>} : memref<16x32xf32, #tpu.memory_space<vmem>>, vector<2x32xf32>,
    %c2 = arith.constant 2 : index
    %c0_19 = arith.constant 0 : index
    %39 = vector.load %arg17[%c2, %c0_19] : memref<16x128xf32, #tpu.memory_space<vmem>>, vector<2x128xf32>
    %cst_20 = arith.constant dense<0.000000e+00> : vector<2x128xf32>
    %40 = tpu.matmul %37, %1, %cst_20 {dimension_numbers = #tpu.dot_dimension_numbers<[1], [0], [0], [1], [0, 0, 1, 1], [], []>} : vector<2x32xf32>, vector<32x128xf32>, vector<2x128xf32> -> vector<2x128xf32>
    %41 = arith.addf %39, %40 : vector<2x128xf32>
    %42 = vector.extract_strided_slice %41 {offsets = [0, 0], sizes = [2, 32], strides = [1, 1]} : vector<2x128xf32> to vector<2x32xf32>
    %43 = arith.negf %42 : vector<2x32xf32>
    %44 = math.exp %43 : vector<2x32xf32>
    %cst_21 = arith.constant 1.000000e+00 : f32
    %45 = vector.broadcast %cst_21 : f32 to vector<2x32xf32>
    %46 = arith.addf %45, %44 : vector<2x32xf32>
    %47 = arith.divf %45, %46 : vector<2x32xf32>
    %48 = vector.extract_strided_slice %41 {offsets = [0, 32], sizes = [2, 32], strides = [1, 1]} : vector<2x128xf32> to vector<2x32xf32>
    %49 = arith.negf %48 : vector<2x32xf32>
    %50 = math.exp %49 : vector<2x32xf32>
    %cst_22 = arith.constant 1.000000e+00 : f32
    %51 = vector.broadcast %cst_22 : f32 to vector<2x32xf32>
    %52 = arith.addf %51, %50 : vector<2x32xf32>
    %53 = arith.divf %51, %52 : vector<2x32xf32>
    %54 = vector.extract_strided_slice %41 {offsets = [0, 64], sizes = [2, 32], strides = [1, 1]} : vector<2x128xf32> to vector<2x32xf32>
    %55 = math.tanh %54 : vector<2x32xf32>
    %56 = vector.extract_strided_slice %41 {offsets = [0, 96], sizes = [2, 32], strides = [1, 1]} : vector<2x128xf32> to vector<2x32xf32>
    %57 = arith.negf %56 : vector<2x32xf32>
    %58 = math.exp %57 : vector<2x32xf32>
    %cst_23 = arith.constant 1.000000e+00 : f32
    %59 = vector.broadcast %cst_23 : f32 to vector<2x32xf32>
    %60 = arith.addf %59, %58 : vector<2x32xf32>
    %61 = arith.divf %59, %60 : vector<2x32xf32>
    %62 = arith.mulf %53, %35 : vector<2x32xf32>
    %63 = arith.mulf %47, %55 : vector<2x32xf32>
    %64 = arith.addf %62, %63 : vector<2x32xf32>
    %65 = math.tanh %64 : vector<2x32xf32>
    %66 = arith.mulf %61, %65 : vector<2x32xf32>
    %c2_24 = arith.constant 2 : index
    %c0_25 = arith.constant 0 : index
    %67 = vector.load %arg18[%c2_24, %c0_25] : memref<16x32xf32, #tpu.memory_space<vmem>>, vector<2x32xf32>
    tpu.vector_store %arg18[%c2_24, %c0_25], %66 {strides = array<i32>} : memref<16x32xf32, #tpu.memory_space<vmem>>, vector<2x32xf32>,
    %c4 = arith.constant 4 : index
    %c0_26 = arith.constant 0 : index
    %68 = vector.load %arg17[%c4, %c0_26] : memref<16x128xf32, #tpu.memory_space<vmem>>, vector<2x128xf32>
    %cst_27 = arith.constant dense<0.000000e+00> : vector<2x128xf32>
    %69 = tpu.matmul %66, %1, %cst_27 {dimension_numbers = #tpu.dot_dimension_numbers<[1], [0], [0], [1], [0, 0, 1, 1], [], []>} : vector<2x32xf32>, vector<32x128xf32>, vector<2x128xf32> -> vector<2x128xf32>
    %70 = arith.addf %68, %69 : vector<2x128xf32>
    %71 = vector.extract_strided_slice %70 {offsets = [0, 0], sizes = [2, 32], strides = [1, 1]} : vector<2x128xf32> to vector<2x32xf32>
    %72 = arith.negf %71 : vector<2x32xf32>
    %73 = math.exp %72 : vector<2x32xf32>
    %cst_28 = arith.constant 1.000000e+00 : f32
    %74 = vector.broadcast %cst_28 : f32 to vector<2x32xf32>
    %75 = arith.addf %74, %73 : vector<2x32xf32>
    %76 = arith.divf %74, %75 : vector<2x32xf32>
    %77 = vector.extract_strided_slice %70 {offsets = [0, 32], sizes = [2, 32], strides = [1, 1]} : vector<2x128xf32> to vector<2x32xf32>
    %78 = arith.negf %77 : vector<2x32xf32>
    %79 = math.exp %78 : vector<2x32xf32>
    %cst_29 = arith.constant 1.000000e+00 : f32
    %80 = vector.broadcast %cst_29 : f32 to vector<2x32xf32>
    %81 = arith.addf %80, %79 : vector<2x32xf32>
    %82 = arith.divf %80, %81 : vector<2x32xf32>
    %83 = vector.extract_strided_slice %70 {offsets = [0, 64], sizes = [2, 32], strides = [1, 1]} : vector<2x128xf32> to vector<2x32xf32>
    %84 = math.tanh %83 : vector<2x32xf32>
    %85 = vector.extract_strided_slice %70 {offsets = [0, 96], sizes = [2, 32], strides = [1, 1]} : vector<2x128xf32> to vector<2x32xf32>
    %86 = arith.negf %85 : vector<2x32xf32>
    %87 = math.exp %86 : vector<2x32xf32>
    %cst_30 = arith.constant 1.000000e+00 : f32
    %88 = vector.broadcast %cst_30 : f32 to vector<2x32xf32>
    %89 = arith.addf %88, %87 : vector<2x32xf32>
    %90 = arith.divf %88, %89 : vector<2x32xf32>
    %91 = arith.mulf %82, %64 : vector<2x32xf32>
    %92 = arith.mulf %76, %84 : vector<2x32xf32>
    %93 = arith.addf %91, %92 : vector<2x32xf32>
    %94 = math.tanh %93 : vector<2x32xf32>
    %95 = arith.mulf %90, %94 : vector<2x32xf32>
    %c4_31 = arith.constant 4 : index
    %c0_32 = arith.constant 0 : index
    %96 = vector.load %arg18[%c4_31, %c0_32] : memref<16x32xf32, #tpu.memory_space<vmem>>, vector<2x32xf32>
    tpu.vector_store %arg18[%c4_31, %c0_32], %95 {strides = array<i32>} : memref<16x32xf32, #tpu.memory_space<vmem>>, vector<2x32xf32>,
    %c6 = arith.constant 6 : index
    %c0_33 = arith.constant 0 : index
    %97 = vector.load %arg17[%c6, %c0_33] : memref<16x128xf32, #tpu.memory_space<vmem>>, vector<2x128xf32>
    %cst_34 = arith.constant dense<0.000000e+00> : vector<2x128xf32>
    %98 = tpu.matmul %95, %1, %cst_34 {dimension_numbers = #tpu.dot_dimension_numbers<[1], [0], [0], [1], [0, 0, 1, 1], [], []>} : vector<2x32xf32>, vector<32x128xf32>, vector<2x128xf32> -> vector<2x128xf32>
    %99 = arith.addf %97, %98 : vector<2x128xf32>
    %100 = vector.extract_strided_slice %99 {offsets = [0, 0], sizes = [2, 32], strides = [1, 1]} : vector<2x128xf32> to vector<2x32xf32>
    %101 = arith.negf %100 : vector<2x32xf32>
    %102 = math.exp %101 : vector<2x32xf32>
    %cst_35 = arith.constant 1.000000e+00 : f32
    %103 = vector.broadcast %cst_35 : f32 to vector<2x32xf32>
    %104 = arith.addf %103, %102 : vector<2x32xf32>
    %105 = arith.divf %103, %104 : vector<2x32xf32>
    %106 = vector.extract_strided_slice %99 {offsets = [0, 32], sizes = [2, 32], strides = [1, 1]} : vector<2x128xf32> to vector<2x32xf32>
    %107 = arith.negf %106 : vector<2x32xf32>
    %108 = math.exp %107 : vector<2x32xf32>
    %cst_36 = arith.constant 1.000000e+00 : f32
    %109 = vector.broadcast %cst_36 : f32 to vector<2x32xf32>
    %110 = arith.addf %109, %108 : vector<2x32xf32>
    %111 = arith.divf %109, %110 : vector<2x32xf32>
    %112 = vector.extract_strided_slice %99 {offsets = [0, 64], sizes = [2, 32], strides = [1, 1]} : vector<2x128xf32> to vector<2x32xf32>
    %113 = math.tanh %112 : vector<2x32xf32>
    %114 = vector.extract_strided_slice %99 {offsets = [0, 96], sizes = [2, 32], strides = [1, 1]} : vector<2x128xf32> to vector<2x32xf32>
    %115 = arith.negf %114 : vector<2x32xf32>
    %116 = math.exp %115 : vector<2x32xf32>
    %cst_37 = arith.constant 1.000000e+00 : f32
    %117 = vector.broadcast %cst_37 : f32 to vector<2x32xf32>
    %118 = arith.addf %117, %116 : vector<2x32xf32>
    %119 = arith.divf %117, %118 : vector<2x32xf32>
    %120 = arith.mulf %111, %93 : vector<2x32xf32>
    %121 = arith.mulf %105, %113 : vector<2x32xf32>
    %122 = arith.addf %120, %121 : vector<2x32xf32>
    %123 = math.tanh %122 : vector<2x32xf32>
    %124 = arith.mulf %119, %123 : vector<2x32xf32>
    %c6_38 = arith.constant 6 : index
    %c0_39 = arith.constant 0 : index
    %125 = vector.load %arg18[%c6_38, %c0_39] : memref<16x32xf32, #tpu.memory_space<vmem>>, vector<2x32xf32>
    tpu.vector_store %arg18[%c6_38, %c0_39], %124 {strides = array<i32>} : memref<16x32xf32, #tpu.memory_space<vmem>>, vector<2x32xf32>,
    %c8 = arith.constant 8 : index
    %c0_40 = arith.constant 0 : index
    %126 = vector.load %arg17[%c8, %c0_40] : memref<16x128xf32, #tpu.memory_space<vmem>>, vector<2x128xf32>
    %cst_41 = arith.constant dense<0.000000e+00> : vector<2x128xf32>
    %127 = tpu.matmul %124, %1, %cst_41 {dimension_numbers = #tpu.dot_dimension_numbers<[1], [0], [0], [1], [0, 0, 1, 1], [], []>} : vector<2x32xf32>, vector<32x128xf32>, vector<2x128xf32> -> vector<2x128xf32>
    %128 = arith.addf %126, %127 : vector<2x128xf32>
    %129 = vector.extract_strided_slice %128 {offsets = [0, 0], sizes = [2, 32], strides = [1, 1]} : vector<2x128xf32> to vector<2x32xf32>
    %130 = arith.negf %129 : vector<2x32xf32>
    %131 = math.exp %130 : vector<2x32xf32>
    %cst_42 = arith.constant 1.000000e+00 : f32
    %132 = vector.broadcast %cst_42 : f32 to vector<2x32xf32>
    %133 = arith.addf %132, %131 : vector<2x32xf32>
    %134 = arith.divf %132, %133 : vector<2x32xf32>
    %135 = vector.extract_strided_slice %128 {offsets = [0, 32], sizes = [2, 32], strides = [1, 1]} : vector<2x128xf32> to vector<2x32xf32>
    %136 = arith.negf %135 : vector<2x32xf32>
    %137 = math.exp %136 : vector<2x32xf32>
    %cst_43 = arith.constant 1.000000e+00 : f32
    %138 = vector.broadcast %cst_43 : f32 to vector<2x32xf32>
    %139 = arith.addf %138, %137 : vector<2x32xf32>
    %140 = arith.divf %138, %139 : vector<2x32xf32>
    %141 = vector.extract_strided_slice %128 {offsets = [0, 64], sizes = [2, 32], strides = [1, 1]} : vector<2x128xf32> to vector<2x32xf32>
    %142 = math.tanh %141 : vector<2x32xf32>
    %143 = vector.extract_strided_slice %128 {offsets = [0, 96], sizes = [2, 32], strides = [1, 1]} : vector<2x128xf32> to vector<2x32xf32>
    %144 = arith.negf %143 : vector<2x32xf32>
    %145 = math.exp %144 : vector<2x32xf32>
    %cst_44 = arith.constant 1.000000e+00 : f32
    %146 = vector.broadcast %cst_44 : f32 to vector<2x32xf32>
    %147 = arith.addf %146, %145 : vector<2x32xf32>
    %148 = arith.divf %146, %147 : vector<2x32xf32>
    %149 = arith.mulf %140, %122 : vector<2x32xf32>
    %150 = arith.mulf %134, %142 : vector<2x32xf32>
    %151 = arith.addf %149, %150 : vector<2x32xf32>
    %152 = math.tanh %151 : vector<2x32xf32>
    %153 = arith.mulf %148, %152 : vector<2x32xf32>
    %c8_45 = arith.constant 8 : index
    %c0_46 = arith.constant 0 : index
    %154 = vector.load %arg18[%c8_45, %c0_46] : memref<16x32xf32, #tpu.memory_space<vmem>>, vector<2x32xf32>
    tpu.vector_store %arg18[%c8_45, %c0_46], %153 {strides = array<i32>} : memref<16x32xf32, #tpu.memory_space<vmem>>, vector<2x32xf32>,
    %c10 = arith.constant 10 : index
    %c0_47 = arith.constant 0 : index
    %155 = vector.load %arg17[%c10, %c0_47] : memref<16x128xf32, #tpu.memory_space<vmem>>, vector<2x128xf32>
    %cst_48 = arith.constant dense<0.000000e+00> : vector<2x128xf32>
    %156 = tpu.matmul %153, %1, %cst_48 {dimension_numbers = #tpu.dot_dimension_numbers<[1], [0], [0], [1], [0, 0, 1, 1], [], []>} : vector<2x32xf32>, vector<32x128xf32>, vector<2x128xf32> -> vector<2x128xf32>
    %157 = arith.addf %155, %156 : vector<2x128xf32>
    %158 = vector.extract_strided_slice %157 {offsets = [0, 0], sizes = [2, 32], strides = [1, 1]} : vector<2x128xf32> to vector<2x32xf32>
    %159 = arith.negf %158 : vector<2x32xf32>
    %160 = math.exp %159 : vector<2x32xf32>
    %cst_49 = arith.constant 1.000000e+00 : f32
    %161 = vector.broadcast %cst_49 : f32 to vector<2x32xf32>
    %162 = arith.addf %161, %160 : vector<2x32xf32>
    %163 = arith.divf %161, %162 : vector<2x32xf32>
    %164 = vector.extract_strided_slice %157 {offsets = [0, 32], sizes = [2, 32], strides = [1, 1]} : vector<2x128xf32> to vector<2x32xf32>
    %165 = arith.negf %164 : vector<2x32xf32>
    %166 = math.exp %165 : vector<2x32xf32>
    %cst_50 = arith.constant 1.000000e+00 : f32
    %167 = vector.broadcast %cst_50 : f32 to vector<2x32xf32>
    %168 = arith.addf %167, %166 : vector<2x32xf32>
    %169 = arith.divf %167, %168 : vector<2x32xf32>
    %170 = vector.extract_strided_slice %157 {offsets = [0, 64], sizes = [2, 32], strides = [1, 1]} : vector<2x128xf32> to vector<2x32xf32>
    %171 = math.tanh %170 : vector<2x32xf32>
    %172 = vector.extract_strided_slice %157 {offsets = [0, 96], sizes = [2, 32], strides = [1, 1]} : vector<2x128xf32> to vector<2x32xf32>
    %173 = arith.negf %172 : vector<2x32xf32>
    %174 = math.exp %173 : vector<2x32xf32>
    %cst_51 = arith.constant 1.000000e+00 : f32
    %175 = vector.broadcast %cst_51 : f32 to vector<2x32xf32>
    %176 = arith.addf %175, %174 : vector<2x32xf32>
    %177 = arith.divf %175, %176 : vector<2x32xf32>
    %178 = arith.mulf %169, %151 : vector<2x32xf32>
    %179 = arith.mulf %163, %171 : vector<2x32xf32>
    %180 = arith.addf %178, %179 : vector<2x32xf32>
    %181 = math.tanh %180 : vector<2x32xf32>
    %182 = arith.mulf %177, %181 : vector<2x32xf32>
    %c10_52 = arith.constant 10 : index
    %c0_53 = arith.constant 0 : index
    %183 = vector.load %arg18[%c10_52, %c0_53] : memref<16x32xf32, #tpu.memory_space<vmem>>, vector<2x32xf32>
    tpu.vector_store %arg18[%c10_52, %c0_53], %182 {strides = array<i32>} : memref<16x32xf32, #tpu.memory_space<vmem>>, vector<2x32xf32>,
    %c12 = arith.constant 12 : index
    %c0_54 = arith.constant 0 : index
    %184 = vector.load %arg17[%c12, %c0_54] : memref<16x128xf32, #tpu.memory_space<vmem>>, vector<2x128xf32>
    %cst_55 = arith.constant dense<0.000000e+00> : vector<2x128xf32>
    %185 = tpu.matmul %182, %1, %cst_55 {dimension_numbers = #tpu.dot_dimension_numbers<[1], [0], [0], [1], [0, 0, 1, 1], [], []>} : vector<2x32xf32>, vector<32x128xf32>, vector<2x128xf32> -> vector<2x128xf32>
    %186 = arith.addf %184, %185 : vector<2x128xf32>
    %187 = vector.extract_strided_slice %186 {offsets = [0, 0], sizes = [2, 32], strides = [1, 1]} : vector<2x128xf32> to vector<2x32xf32>
    %188 = arith.negf %187 : vector<2x32xf32>
    %189 = math.exp %188 : vector<2x32xf32>
    %cst_56 = arith.constant 1.000000e+00 : f32
    %190 = vector.broadcast %cst_56 : f32 to vector<2x32xf32>
    %191 = arith.addf %190, %189 : vector<2x32xf32>
    %192 = arith.divf %190, %191 : vector<2x32xf32>
    %193 = vector.extract_strided_slice %186 {offsets = [0, 32], sizes = [2, 32], strides = [1, 1]} : vector<2x128xf32> to vector<2x32xf32>
    %194 = arith.negf %193 : vector<2x32xf32>
    %195 = math.exp %194 : vector<2x32xf32>
    %cst_57 = arith.constant 1.000000e+00 : f32
    %196 = vector.broadcast %cst_57 : f32 to vector<2x32xf32>
    %197 = arith.addf %196, %195 : vector<2x32xf32>
    %198 = arith.divf %196, %197 : vector<2x32xf32>
    %199 = vector.extract_strided_slice %186 {offsets = [0, 64], sizes = [2, 32], strides = [1, 1]} : vector<2x128xf32> to vector<2x32xf32>
    %200 = math.tanh %199 : vector<2x32xf32>
    %201 = vector.extract_strided_slice %186 {offsets = [0, 96], sizes = [2, 32], strides = [1, 1]} : vector<2x128xf32> to vector<2x32xf32>
    %202 = arith.negf %201 : vector<2x32xf32>
    %203 = math.exp %202 : vector<2x32xf32>
    %cst_58 = arith.constant 1.000000e+00 : f32
    %204 = vector.broadcast %cst_58 : f32 to vector<2x32xf32>
    %205 = arith.addf %204, %203 : vector<2x32xf32>
    %206 = arith.divf %204, %205 : vector<2x32xf32>
    %207 = arith.mulf %198, %180 : vector<2x32xf32>
    %208 = arith.mulf %192, %200 : vector<2x32xf32>
    %209 = arith.addf %207, %208 : vector<2x32xf32>
    %210 = math.tanh %209 : vector<2x32xf32>
    %211 = arith.mulf %206, %210 : vector<2x32xf32>
    %c12_59 = arith.constant 12 : index
    %c0_60 = arith.constant 0 : index
    %212 = vector.load %arg18[%c12_59, %c0_60] : memref<16x32xf32, #tpu.memory_space<vmem>>, vector<2x32xf32>
    tpu.vector_store %arg18[%c12_59, %c0_60], %211 {strides = array<i32>} : memref<16x32xf32, #tpu.memory_space<vmem>>, vector<2x32xf32>,
    %c14 = arith.constant 14 : index
    %c0_61 = arith.constant 0 : index
    %213 = vector.load %arg17[%c14, %c0_61] : memref<16x128xf32, #tpu.memory_space<vmem>>, vector<2x128xf32>
    %cst_62 = arith.constant dense<0.000000e+00> : vector<2x128xf32>
    %214 = tpu.matmul %211, %1, %cst_62 {dimension_numbers = #tpu.dot_dimension_numbers<[1], [0], [0], [1], [0, 0, 1, 1], [], []>} : vector<2x32xf32>, vector<32x128xf32>, vector<2x128xf32> -> vector<2x128xf32>
    %215 = arith.addf %213, %214 : vector<2x128xf32>
    %216 = vector.extract_strided_slice %215 {offsets = [0, 0], sizes = [2, 32], strides = [1, 1]} : vector<2x128xf32> to vector<2x32xf32>
    %217 = arith.negf %216 : vector<2x32xf32>
    %218 = math.exp %217 : vector<2x32xf32>
    %cst_63 = arith.constant 1.000000e+00 : f32
    %219 = vector.broadcast %cst_63 : f32 to vector<2x32xf32>
    %220 = arith.addf %219, %218 : vector<2x32xf32>
    %221 = arith.divf %219, %220 : vector<2x32xf32>
    %222 = vector.extract_strided_slice %215 {offsets = [0, 32], sizes = [2, 32], strides = [1, 1]} : vector<2x128xf32> to vector<2x32xf32>
    %223 = arith.negf %222 : vector<2x32xf32>
    %224 = math.exp %223 : vector<2x32xf32>
    %cst_64 = arith.constant 1.000000e+00 : f32
    %225 = vector.broadcast %cst_64 : f32 to vector<2x32xf32>
    %226 = arith.addf %225, %224 : vector<2x32xf32>
    %227 = arith.divf %225, %226 : vector<2x32xf32>
    %228 = vector.extract_strided_slice %215 {offsets = [0, 64], sizes = [2, 32], strides = [1, 1]} : vector<2x128xf32> to vector<2x32xf32>
    %229 = math.tanh %228 : vector<2x32xf32>
    %230 = vector.extract_strided_slice %215 {offsets = [0, 96], sizes = [2, 32], strides = [1, 1]} : vector<2x128xf32> to vector<2x32xf32>
    %231 = arith.negf %230 : vector<2x32xf32>
    %232 = math.exp %231 : vector<2x32xf32>
    %cst_65 = arith.constant 1.000000e+00 : f32
    %233 = vector.broadcast %cst_65 : f32 to vector<2x32xf32>
    %234 = arith.addf %233, %232 : vector<2x32xf32>
    %235 = arith.divf %233, %234 : vector<2x32xf32>
    %236 = arith.mulf %227, %209 : vector<2x32xf32>
    %237 = arith.mulf %221, %229 : vector<2x32xf32>
    %238 = arith.addf %236, %237 : vector<2x32xf32>
    %239 = math.tanh %238 : vector<2x32xf32>
    %240 = arith.mulf %235, %239 : vector<2x32xf32>
    %c14_66 = arith.constant 14 : index
    %c0_67 = arith.constant 0 : index
    %241 = vector.load %arg18[%c14_66, %c0_67] : memref<16x32xf32, #tpu.memory_space<vmem>>, vector<2x32xf32>
    tpu.vector_store %arg18[%c14_66, %c0_67], %240 {strides = array<i32>} : memref<16x32xf32, #tpu.memory_space<vmem>>, vector<2x32xf32>,
    %c0_68 = arith.constant 0 : index
    %c0_69 = arith.constant 0 : index
    %242 = vector.load %arg5[%c0_68, %c0_69] : memref<32x128xf32, #tpu.memory_space<vmem>>, vector<32x128xf32>
    %c0_70 = arith.constant 0 : index
    %c0_71 = arith.constant 0 : index
    %243 = vector.load %arg6[%c0_70, %c0_71] : memref<32x128xf32, #tpu.memory_space<vmem>>, vector<32x128xf32>
    %c0_72 = arith.constant 0 : index
    %c0_73 = arith.constant 0 : index
    %244 = vector.load %arg7[%c0_72, %c0_73] : memref<1x128xf32, #tpu.memory_space<vmem>>, vector<1x128xf32>
    %c0_74 = arith.constant 0 : index
    %c0_75 = arith.constant 0 : index
    %245 = vector.load %arg18[%c0_74, %c0_75] : memref<16x32xf32, #tpu.memory_space<vmem>>, vector<16x32xf32>
    %cst_76 = arith.constant dense<0.000000e+00> : vector<16x128xf32>
    %246 = tpu.matmul %245, %242, %cst_76 {dimension_numbers = #tpu.dot_dimension_numbers<[1], [0], [0], [1], [0, 0, 1, 1], [], []>} : vector<16x32xf32>, vector<32x128xf32>, vector<16x128xf32> -> vector<16x128xf32>
    %247 = vector.broadcast %244 : vector<1x128xf32> to vector<16x128xf32>
    %248 = arith.addf %246, %247 : vector<16x128xf32>
    %c0_77 = arith.constant 0 : index
    %c0_78 = arith.constant 0 : index
    %249 = vector.load %arg17[%c0_77, %c0_78] : memref<16x128xf32, #tpu.memory_space<vmem>>, vector<16x128xf32>
    tpu.vector_store %arg17[%c0_77, %c0_78], %248 {strides = array<i32>} : memref<16x128xf32, #tpu.memory_space<vmem>>, vector<16x128xf32>,
    %cst_79 = arith.constant 0.000000e+00 : f32
    %250 = vector.broadcast %cst_79 : f32 to vector<2x32xf32>
    %cst_80 = arith.constant 0.000000e+00 : f32
    %251 = vector.broadcast %cst_80 : f32 to vector<2x32xf32>
    %c0_81 = arith.constant 0 : index
    %c0_82 = arith.constant 0 : index
    %252 = vector.load %arg17[%c0_81, %c0_82] : memref<16x128xf32, #tpu.memory_space<vmem>>, vector<2x128xf32>
    %cst_83 = arith.constant dense<0.000000e+00> : vector<2x128xf32>
    %253 = tpu.matmul %250, %243, %cst_83 {dimension_numbers = #tpu.dot_dimension_numbers<[1], [0], [0], [1], [0, 0, 1, 1], [], []>} : vector<2x32xf32>, vector<32x128xf32>, vector<2x128xf32> -> vector<2x128xf32>
    %254 = arith.addf %252, %253 : vector<2x128xf32>
    %255 = vector.extract_strided_slice %254 {offsets = [0, 0], sizes = [2, 32], strides = [1, 1]} : vector<2x128xf32> to vector<2x32xf32>
    %256 = arith.negf %255 : vector<2x32xf32>
    %257 = math.exp %256 : vector<2x32xf32>
    %cst_84 = arith.constant 1.000000e+00 : f32
    %258 = vector.broadcast %cst_84 : f32 to vector<2x32xf32>
    %259 = arith.addf %258, %257 : vector<2x32xf32>
    %260 = arith.divf %258, %259 : vector<2x32xf32>
    %261 = vector.extract_strided_slice %254 {offsets = [0, 32], sizes = [2, 32], strides = [1, 1]} : vector<2x128xf32> to vector<2x32xf32>
    %262 = arith.negf %261 : vector<2x32xf32>
    %263 = math.exp %262 : vector<2x32xf32>
    %cst_85 = arith.constant 1.000000e+00 : f32
    %264 = vector.broadcast %cst_85 : f32 to vector<2x32xf32>
    %265 = arith.addf %264, %263 : vector<2x32xf32>
    %266 = arith.divf %264, %265 : vector<2x32xf32>
    %267 = vector.extract_strided_slice %254 {offsets = [0, 64], sizes = [2, 32], strides = [1, 1]} : vector<2x128xf32> to vector<2x32xf32>
    %268 = math.tanh %267 : vector<2x32xf32>
    %269 = vector.extract_strided_slice %254 {offsets = [0, 96], sizes = [2, 32], strides = [1, 1]} : vector<2x128xf32> to vector<2x32xf32>
    %270 = arith.negf %269 : vector<2x32xf32>
    %271 = math.exp %270 : vector<2x32xf32>
    %cst_86 = arith.constant 1.000000e+00 : f32
    %272 = vector.broadcast %cst_86 : f32 to vector<2x32xf32>
    %273 = arith.addf %272, %271 : vector<2x32xf32>
    %274 = arith.divf %272, %273 : vector<2x32xf32>
    %275 = arith.mulf %266, %251 : vector<2x32xf32>
    %276 = arith.mulf %260, %268 : vector<2x32xf32>
    %277 = arith.addf %275, %276 : vector<2x32xf32>
    %278 = math.tanh %277 : vector<2x32xf32>
    %279 = arith.mulf %274, %278 : vector<2x32xf32>
    %c0_87 = arith.constant 0 : index
    %c0_88 = arith.constant 0 : index
    %280 = vector.load %arg18[%c0_87, %c0_88] : memref<16x32xf32, #tpu.memory_space<vmem>>, vector<2x32xf32>
    tpu.vector_store %arg18[%c0_87, %c0_88], %279 {strides = array<i32>} : memref<16x32xf32, #tpu.memory_space<vmem>>, vector<2x32xf32>,
    %c2_89 = arith.constant 2 : index
    %c0_90 = arith.constant 0 : index
    %281 = vector.load %arg17[%c2_89, %c0_90] : memref<16x128xf32, #tpu.memory_space<vmem>>, vector<2x128xf32>
    %cst_91 = arith.constant dense<0.000000e+00> : vector<2x128xf32>
    %282 = tpu.matmul %279, %243, %cst_91 {dimension_numbers = #tpu.dot_dimension_numbers<[1], [0], [0], [1], [0, 0, 1, 1], [], []>} : vector<2x32xf32>, vector<32x128xf32>, vector<2x128xf32> -> vector<2x128xf32>
    %283 = arith.addf %281, %282 : vector<2x128xf32>
    %284 = vector.extract_strided_slice %283 {offsets = [0, 0], sizes = [2, 32], strides = [1, 1]} : vector<2x128xf32> to vector<2x32xf32>
    %285 = arith.negf %284 : vector<2x32xf32>
    %286 = math.exp %285 : vector<2x32xf32>
    %cst_92 = arith.constant 1.000000e+00 : f32
    %287 = vector.broadcast %cst_92 : f32 to vector<2x32xf32>
    %288 = arith.addf %287, %286 : vector<2x32xf32>
    %289 = arith.divf %287, %288 : vector<2x32xf32>
    %290 = vector.extract_strided_slice %283 {offsets = [0, 32], sizes = [2, 32], strides = [1, 1]} : vector<2x128xf32> to vector<2x32xf32>
    %291 = arith.negf %290 : vector<2x32xf32>
    %292 = math.exp %291 : vector<2x32xf32>
    %cst_93 = arith.constant 1.000000e+00 : f32
    %293 = vector.broadcast %cst_93 : f32 to vector<2x32xf32>
    %294 = arith.addf %293, %292 : vector<2x32xf32>
    %295 = arith.divf %293, %294 : vector<2x32xf32>
    %296 = vector.extract_strided_slice %283 {offsets = [0, 64], sizes = [2, 32], strides = [1, 1]} : vector<2x128xf32> to vector<2x32xf32>
    %297 = math.tanh %296 : vector<2x32xf32>
    %298 = vector.extract_strided_slice %283 {offsets = [0, 96], sizes = [2, 32], strides = [1, 1]} : vector<2x128xf32> to vector<2x32xf32>
    %299 = arith.negf %298 : vector<2x32xf32>
    %300 = math.exp %299 : vector<2x32xf32>
    %cst_94 = arith.constant 1.000000e+00 : f32
    %301 = vector.broadcast %cst_94 : f32 to vector<2x32xf32>
    %302 = arith.addf %301, %300 : vector<2x32xf32>
    %303 = arith.divf %301, %302 : vector<2x32xf32>
    %304 = arith.mulf %295, %277 : vector<2x32xf32>
    %305 = arith.mulf %289, %297 : vector<2x32xf32>
    %306 = arith.addf %304, %305 : vector<2x32xf32>
    %307 = math.tanh %306 : vector<2x32xf32>
    %308 = arith.mulf %303, %307 : vector<2x32xf32>
    %c2_95 = arith.constant 2 : index
    %c0_96 = arith.constant 0 : index
    %309 = vector.load %arg18[%c2_95, %c0_96] : memref<16x32xf32, #tpu.memory_space<vmem>>, vector<2x32xf32>
    tpu.vector_store %arg18[%c2_95, %c0_96], %308 {strides = array<i32>} : memref<16x32xf32, #tpu.memory_space<vmem>>, vector<2x32xf32>,
    %c4_97 = arith.constant 4 : index
    %c0_98 = arith.constant 0 : index
    %310 = vector.load %arg17[%c4_97, %c0_98] : memref<16x128xf32, #tpu.memory_space<vmem>>, vector<2x128xf32>
    %cst_99 = arith.constant dense<0.000000e+00> : vector<2x128xf32>
    %311 = tpu.matmul %308, %243, %cst_99 {dimension_numbers = #tpu.dot_dimension_numbers<[1], [0], [0], [1], [0, 0, 1, 1], [], []>} : vector<2x32xf32>, vector<32x128xf32>, vector<2x128xf32> -> vector<2x128xf32>
    %312 = arith.addf %310, %311 : vector<2x128xf32>
    %313 = vector.extract_strided_slice %312 {offsets = [0, 0], sizes = [2, 32], strides = [1, 1]} : vector<2x128xf32> to vector<2x32xf32>
    %314 = arith.negf %313 : vector<2x32xf32>
    %315 = math.exp %314 : vector<2x32xf32>
    %cst_100 = arith.constant 1.000000e+00 : f32
    %316 = vector.broadcast %cst_100 : f32 to vector<2x32xf32>
    %317 = arith.addf %316, %315 : vector<2x32xf32>
    %318 = arith.divf %316, %317 : vector<2x32xf32>
    %319 = vector.extract_strided_slice %312 {offsets = [0, 32], sizes = [2, 32], strides = [1, 1]} : vector<2x128xf32> to vector<2x32xf32>
    %320 = arith.negf %319 : vector<2x32xf32>
    %321 = math.exp %320 : vector<2x32xf32>
    %cst_101 = arith.constant 1.000000e+00 : f32
    %322 = vector.broadcast %cst_101 : f32 to vector<2x32xf32>
    %323 = arith.addf %322, %321 : vector<2x32xf32>
    %324 = arith.divf %322, %323 : vector<2x32xf32>
    %325 = vector.extract_strided_slice %312 {offsets = [0, 64], sizes = [2, 32], strides = [1, 1]} : vector<2x128xf32> to vector<2x32xf32>
    %326 = math.tanh %325 : vector<2x32xf32>
    %327 = vector.extract_strided_slice %312 {offsets = [0, 96], sizes = [2, 32], strides = [1, 1]} : vector<2x128xf32> to vector<2x32xf32>
    %328 = arith.negf %327 : vector<2x32xf32>
    %329 = math.exp %328 : vector<2x32xf32>
    %cst_102 = arith.constant 1.000000e+00 : f32
    %330 = vector.broadcast %cst_102 : f32 to vector<2x32xf32>
    %331 = arith.addf %330, %329 : vector<2x32xf32>
    %332 = arith.divf %330, %331 : vector<2x32xf32>
    %333 = arith.mulf %324, %306 : vector<2x32xf32>
    %334 = arith.mulf %318, %326 : vector<2x32xf32>
    %335 = arith.addf %333, %334 : vector<2x32xf32>
    %336 = math.tanh %335 : vector<2x32xf32>
    %337 = arith.mulf %332, %336 : vector<2x32xf32>
    %c4_103 = arith.constant 4 : index
    %c0_104 = arith.constant 0 : index
    %338 = vector.load %arg18[%c4_103, %c0_104] : memref<16x32xf32, #tpu.memory_space<vmem>>, vector<2x32xf32>
    tpu.vector_store %arg18[%c4_103, %c0_104], %337 {strides = array<i32>} : memref<16x32xf32, #tpu.memory_space<vmem>>, vector<2x32xf32>,
    %c6_105 = arith.constant 6 : index
    %c0_106 = arith.constant 0 : index
    %339 = vector.load %arg17[%c6_105, %c0_106] : memref<16x128xf32, #tpu.memory_space<vmem>>, vector<2x128xf32>
    %cst_107 = arith.constant dense<0.000000e+00> : vector<2x128xf32>
    %340 = tpu.matmul %337, %243, %cst_107 {dimension_numbers = #tpu.dot_dimension_numbers<[1], [0], [0], [1], [0, 0, 1, 1], [], []>} : vector<2x32xf32>, vector<32x128xf32>, vector<2x128xf32> -> vector<2x128xf32>
    %341 = arith.addf %339, %340 : vector<2x128xf32>
    %342 = vector.extract_strided_slice %341 {offsets = [0, 0], sizes = [2, 32], strides = [1, 1]} : vector<2x128xf32> to vector<2x32xf32>
    %343 = arith.negf %342 : vector<2x32xf32>
    %344 = math.exp %343 : vector<2x32xf32>
    %cst_108 = arith.constant 1.000000e+00 : f32
    %345 = vector.broadcast %cst_108 : f32 to vector<2x32xf32>
    %346 = arith.addf %345, %344 : vector<2x32xf32>
    %347 = arith.divf %345, %346 : vector<2x32xf32>
    %348 = vector.extract_strided_slice %341 {offsets = [0, 32], sizes = [2, 32], strides = [1, 1]} : vector<2x128xf32> to vector<2x32xf32>
    %349 = arith.negf %348 : vector<2x32xf32>
    %350 = math.exp %349 : vector<2x32xf32>
    %cst_109 = arith.constant 1.000000e+00 : f32
    %351 = vector.broadcast %cst_109 : f32 to vector<2x32xf32>
    %352 = arith.addf %351, %350 : vector<2x32xf32>
    %353 = arith.divf %351, %352 : vector<2x32xf32>
    %354 = vector.extract_strided_slice %341 {offsets = [0, 64], sizes = [2, 32], strides = [1, 1]} : vector<2x128xf32> to vector<2x32xf32>
    %355 = math.tanh %354 : vector<2x32xf32>
    %356 = vector.extract_strided_slice %341 {offsets = [0, 96], sizes = [2, 32], strides = [1, 1]} : vector<2x128xf32> to vector<2x32xf32>
    %357 = arith.negf %356 : vector<2x32xf32>
    %358 = math.exp %357 : vector<2x32xf32>
    %cst_110 = arith.constant 1.000000e+00 : f32
    %359 = vector.broadcast %cst_110 : f32 to vector<2x32xf32>
    %360 = arith.addf %359, %358 : vector<2x32xf32>
    %361 = arith.divf %359, %360 : vector<2x32xf32>
    %362 = arith.mulf %353, %335 : vector<2x32xf32>
    %363 = arith.mulf %347, %355 : vector<2x32xf32>
    %364 = arith.addf %362, %363 : vector<2x32xf32>
    %365 = math.tanh %364 : vector<2x32xf32>
    %366 = arith.mulf %361, %365 : vector<2x32xf32>
    %c6_111 = arith.constant 6 : index
    %c0_112 = arith.constant 0 : index
    %367 = vector.load %arg18[%c6_111, %c0_112] : memref<16x32xf32, #tpu.memory_space<vmem>>, vector<2x32xf32>
    tpu.vector_store %arg18[%c6_111, %c0_112], %366 {strides = array<i32>} : memref<16x32xf32, #tpu.memory_space<vmem>>, vector<2x32xf32>,
    %c8_113 = arith.constant 8 : index
    %c0_114 = arith.constant 0 : index
    %368 = vector.load %arg17[%c8_113, %c0_114] : memref<16x128xf32, #tpu.memory_space<vmem>>, vector<2x128xf32>
    %cst_115 = arith.constant dense<0.000000e+00> : vector<2x128xf32>
    %369 = tpu.matmul %366, %243, %cst_115 {dimension_numbers = #tpu.dot_dimension_numbers<[1], [0], [0], [1], [0, 0, 1, 1], [], []>} : vector<2x32xf32>, vector<32x128xf32>, vector<2x128xf32> -> vector<2x128xf32>
    %370 = arith.addf %368, %369 : vector<2x128xf32>
    %371 = vector.extract_strided_slice %370 {offsets = [0, 0], sizes = [2, 32], strides = [1, 1]} : vector<2x128xf32> to vector<2x32xf32>
    %372 = arith.negf %371 : vector<2x32xf32>
    %373 = math.exp %372 : vector<2x32xf32>
    %cst_116 = arith.constant 1.000000e+00 : f32
    %374 = vector.broadcast %cst_116 : f32 to vector<2x32xf32>
    %375 = arith.addf %374, %373 : vector<2x32xf32>
    %376 = arith.divf %374, %375 : vector<2x32xf32>
    %377 = vector.extract_strided_slice %370 {offsets = [0, 32], sizes = [2, 32], strides = [1, 1]} : vector<2x128xf32> to vector<2x32xf32>
    %378 = arith.negf %377 : vector<2x32xf32>
    %379 = math.exp %378 : vector<2x32xf32>
    %cst_117 = arith.constant 1.000000e+00 : f32
    %380 = vector.broadcast %cst_117 : f32 to vector<2x32xf32>
    %381 = arith.addf %380, %379 : vector<2x32xf32>
    %382 = arith.divf %380, %381 : vector<2x32xf32>
    %383 = vector.extract_strided_slice %370 {offsets = [0, 64], sizes = [2, 32], strides = [1, 1]} : vector<2x128xf32> to vector<2x32xf32>
    %384 = math.tanh %383 : vector<2x32xf32>
    %385 = vector.extract_strided_slice %370 {offsets = [0, 96], sizes = [2, 32], strides = [1, 1]} : vector<2x128xf32> to vector<2x32xf32>
    %386 = arith.negf %385 : vector<2x32xf32>
    %387 = math.exp %386 : vector<2x32xf32>
    %cst_118 = arith.constant 1.000000e+00 : f32
    %388 = vector.broadcast %cst_118 : f32 to vector<2x32xf32>
    %389 = arith.addf %388, %387 : vector<2x32xf32>
    %390 = arith.divf %388, %389 : vector<2x32xf32>
    %391 = arith.mulf %382, %364 : vector<2x32xf32>
    %392 = arith.mulf %376, %384 : vector<2x32xf32>
    %393 = arith.addf %391, %392 : vector<2x32xf32>
    %394 = math.tanh %393 : vector<2x32xf32>
    %395 = arith.mulf %390, %394 : vector<2x32xf32>
    %c8_119 = arith.constant 8 : index
    %c0_120 = arith.constant 0 : index
    %396 = vector.load %arg18[%c8_119, %c0_120] : memref<16x32xf32, #tpu.memory_space<vmem>>, vector<2x32xf32>
    tpu.vector_store %arg18[%c8_119, %c0_120], %395 {strides = array<i32>} : memref<16x32xf32, #tpu.memory_space<vmem>>, vector<2x32xf32>,
    %c10_121 = arith.constant 10 : index
    %c0_122 = arith.constant 0 : index
    %397 = vector.load %arg17[%c10_121, %c0_122] : memref<16x128xf32, #tpu.memory_space<vmem>>, vector<2x128xf32>
    %cst_123 = arith.constant dense<0.000000e+00> : vector<2x128xf32>
    %398 = tpu.matmul %395, %243, %cst_123 {dimension_numbers = #tpu.dot_dimension_numbers<[1], [0], [0], [1], [0, 0, 1, 1], [], []>} : vector<2x32xf32>, vector<32x128xf32>, vector<2x128xf32> -> vector<2x128xf32>
    %399 = arith.addf %397, %398 : vector<2x128xf32>
    %400 = vector.extract_strided_slice %399 {offsets = [0, 0], sizes = [2, 32], strides = [1, 1]} : vector<2x128xf32> to vector<2x32xf32>
    %401 = arith.negf %400 : vector<2x32xf32>
    %402 = math.exp %401 : vector<2x32xf32>
    %cst_124 = arith.constant 1.000000e+00 : f32
    %403 = vector.broadcast %cst_124 : f32 to vector<2x32xf32>
    %404 = arith.addf %403, %402 : vector<2x32xf32>
    %405 = arith.divf %403, %404 : vector<2x32xf32>
    %406 = vector.extract_strided_slice %399 {offsets = [0, 32], sizes = [2, 32], strides = [1, 1]} : vector<2x128xf32> to vector<2x32xf32>
    %407 = arith.negf %406 : vector<2x32xf32>
    %408 = math.exp %407 : vector<2x32xf32>
    %cst_125 = arith.constant 1.000000e+00 : f32
    %409 = vector.broadcast %cst_125 : f32 to vector<2x32xf32>
    %410 = arith.addf %409, %408 : vector<2x32xf32>
    %411 = arith.divf %409, %410 : vector<2x32xf32>
    %412 = vector.extract_strided_slice %399 {offsets = [0, 64], sizes = [2, 32], strides = [1, 1]} : vector<2x128xf32> to vector<2x32xf32>
    %413 = math.tanh %412 : vector<2x32xf32>
    %414 = vector.extract_strided_slice %399 {offsets = [0, 96], sizes = [2, 32], strides = [1, 1]} : vector<2x128xf32> to vector<2x32xf32>
    %415 = arith.negf %414 : vector<2x32xf32>
    %416 = math.exp %415 : vector<2x32xf32>
    %cst_126 = arith.constant 1.000000e+00 : f32
    %417 = vector.broadcast %cst_126 : f32 to vector<2x32xf32>
    %418 = arith.addf %417, %416 : vector<2x32xf32>
    %419 = arith.divf %417, %418 : vector<2x32xf32>
    %420 = arith.mulf %411, %393 : vector<2x32xf32>
    %421 = arith.mulf %405, %413 : vector<2x32xf32>
    %422 = arith.addf %420, %421 : vector<2x32xf32>
    %423 = math.tanh %422 : vector<2x32xf32>
    %424 = arith.mulf %419, %423 : vector<2x32xf32>
    %c10_127 = arith.constant 10 : index
    %c0_128 = arith.constant 0 : index
    %425 = vector.load %arg18[%c10_127, %c0_128] : memref<16x32xf32, #tpu.memory_space<vmem>>, vector<2x32xf32>
    tpu.vector_store %arg18[%c10_127, %c0_128], %424 {strides = array<i32>} : memref<16x32xf32, #tpu.memory_space<vmem>>, vector<2x32xf32>,
    %c12_129 = arith.constant 12 : index
    %c0_130 = arith.constant 0 : index
    %426 = vector.load %arg17[%c12_129, %c0_130] : memref<16x128xf32, #tpu.memory_space<vmem>>, vector<2x128xf32>
    %cst_131 = arith.constant dense<0.000000e+00> : vector<2x128xf32>
    %427 = tpu.matmul %424, %243, %cst_131 {dimension_numbers = #tpu.dot_dimension_numbers<[1], [0], [0], [1], [0, 0, 1, 1], [], []>} : vector<2x32xf32>, vector<32x128xf32>, vector<2x128xf32> -> vector<2x128xf32>
    %428 = arith.addf %426, %427 : vector<2x128xf32>
    %429 = vector.extract_strided_slice %428 {offsets = [0, 0], sizes = [2, 32], strides = [1, 1]} : vector<2x128xf32> to vector<2x32xf32>
    %430 = arith.negf %429 : vector<2x32xf32>
    %431 = math.exp %430 : vector<2x32xf32>
    %cst_132 = arith.constant 1.000000e+00 : f32
    %432 = vector.broadcast %cst_132 : f32 to vector<2x32xf32>
    %433 = arith.addf %432, %431 : vector<2x32xf32>
    %434 = arith.divf %432, %433 : vector<2x32xf32>
    %435 = vector.extract_strided_slice %428 {offsets = [0, 32], sizes = [2, 32], strides = [1, 1]} : vector<2x128xf32> to vector<2x32xf32>
    %436 = arith.negf %435 : vector<2x32xf32>
    %437 = math.exp %436 : vector<2x32xf32>
    %cst_133 = arith.constant 1.000000e+00 : f32
    %438 = vector.broadcast %cst_133 : f32 to vector<2x32xf32>
    %439 = arith.addf %438, %437 : vector<2x32xf32>
    %440 = arith.divf %438, %439 : vector<2x32xf32>
    %441 = vector.extract_strided_slice %428 {offsets = [0, 64], sizes = [2, 32], strides = [1, 1]} : vector<2x128xf32> to vector<2x32xf32>
    %442 = math.tanh %441 : vector<2x32xf32>
    %443 = vector.extract_strided_slice %428 {offsets = [0, 96], sizes = [2, 32], strides = [1, 1]} : vector<2x128xf32> to vector<2x32xf32>
    %444 = arith.negf %443 : vector<2x32xf32>
    %445 = math.exp %444 : vector<2x32xf32>
    %cst_134 = arith.constant 1.000000e+00 : f32
    %446 = vector.broadcast %cst_134 : f32 to vector<2x32xf32>
    %447 = arith.addf %446, %445 : vector<2x32xf32>
    %448 = arith.divf %446, %447 : vector<2x32xf32>
    %449 = arith.mulf %440, %422 : vector<2x32xf32>
    %450 = arith.mulf %434, %442 : vector<2x32xf32>
    %451 = arith.addf %449, %450 : vector<2x32xf32>
    %452 = math.tanh %451 : vector<2x32xf32>
    %453 = arith.mulf %448, %452 : vector<2x32xf32>
    %c12_135 = arith.constant 12 : index
    %c0_136 = arith.constant 0 : index
    %454 = vector.load %arg18[%c12_135, %c0_136] : memref<16x32xf32, #tpu.memory_space<vmem>>, vector<2x32xf32>
    tpu.vector_store %arg18[%c12_135, %c0_136], %453 {strides = array<i32>} : memref<16x32xf32, #tpu.memory_space<vmem>>, vector<2x32xf32>,
    %c14_137 = arith.constant 14 : index
    %c0_138 = arith.constant 0 : index
    %455 = vector.load %arg17[%c14_137, %c0_138] : memref<16x128xf32, #tpu.memory_space<vmem>>, vector<2x128xf32>
    %cst_139 = arith.constant dense<0.000000e+00> : vector<2x128xf32>
    %456 = tpu.matmul %453, %243, %cst_139 {dimension_numbers = #tpu.dot_dimension_numbers<[1], [0], [0], [1], [0, 0, 1, 1], [], []>} : vector<2x32xf32>, vector<32x128xf32>, vector<2x128xf32> -> vector<2x128xf32>
    %457 = arith.addf %455, %456 : vector<2x128xf32>
    %458 = vector.extract_strided_slice %457 {offsets = [0, 0], sizes = [2, 32], strides = [1, 1]} : vector<2x128xf32> to vector<2x32xf32>
    %459 = arith.negf %458 : vector<2x32xf32>
    %460 = math.exp %459 : vector<2x32xf32>
    %cst_140 = arith.constant 1.000000e+00 : f32
    %461 = vector.broadcast %cst_140 : f32 to vector<2x32xf32>
    %462 = arith.addf %461, %460 : vector<2x32xf32>
    %463 = arith.divf %461, %462 : vector<2x32xf32>
    %464 = vector.extract_strided_slice %457 {offsets = [0, 32], sizes = [2, 32], strides = [1, 1]} : vector<2x128xf32> to vector<2x32xf32>
    %465 = arith.negf %464 : vector<2x32xf32>
    %466 = math.exp %465 : vector<2x32xf32>
    %cst_141 = arith.constant 1.000000e+00 : f32
    %467 = vector.broadcast %cst_141 : f32 to vector<2x32xf32>
    %468 = arith.addf %467, %466 : vector<2x32xf32>
    %469 = arith.divf %467, %468 : vector<2x32xf32>
    %470 = vector.extract_strided_slice %457 {offsets = [0, 64], sizes = [2, 32], strides = [1, 1]} : vector<2x128xf32> to vector<2x32xf32>
    %471 = math.tanh %470 : vector<2x32xf32>
    %472 = vector.extract_strided_slice %457 {offsets = [0, 96], sizes = [2, 32], strides = [1, 1]} : vector<2x128xf32> to vector<2x32xf32>
    %473 = arith.negf %472 : vector<2x32xf32>
    %474 = math.exp %473 : vector<2x32xf32>
    %cst_142 = arith.constant 1.000000e+00 : f32
    %475 = vector.broadcast %cst_142 : f32 to vector<2x32xf32>
    %476 = arith.addf %475, %474 : vector<2x32xf32>
    %477 = arith.divf %475, %476 : vector<2x32xf32>
    %478 = arith.mulf %469, %451 : vector<2x32xf32>
    %479 = arith.mulf %463, %471 : vector<2x32xf32>
    %480 = arith.addf %478, %479 : vector<2x32xf32>
    %481 = math.tanh %480 : vector<2x32xf32>
    %482 = arith.mulf %477, %481 : vector<2x32xf32>
    %c14_143 = arith.constant 14 : index
    %c0_144 = arith.constant 0 : index
    %483 = vector.load %arg18[%c14_143, %c0_144] : memref<16x32xf32, #tpu.memory_space<vmem>>, vector<2x32xf32>
    tpu.vector_store %arg18[%c14_143, %c0_144], %482 {strides = array<i32>} : memref<16x32xf32, #tpu.memory_space<vmem>>, vector<2x32xf32>,
    %c0_145 = arith.constant 0 : index
    %c0_146 = arith.constant 0 : index
    %484 = vector.load %arg18[%c0_145, %c0_146] : memref<16x32xf32, #tpu.memory_space<vmem>>, vector<16x32xf32>
    %c0_147 = arith.constant 0 : index
    %c0_148 = arith.constant 0 : index
    %485 = vector.load %arg8[%c0_147, %c0_148] : memref<32x16xf32, #tpu.memory_space<vmem>>, vector<32x16xf32>
    %cst_149 = arith.constant dense<0.000000e+00> : vector<16x16xf32>
    %486 = tpu.matmul %484, %485, %cst_149 {dimension_numbers = #tpu.dot_dimension_numbers<[1], [0], [0], [1], [0, 0, 1, 1], [], []>} : vector<16x32xf32>, vector<32x16xf32>, vector<16x16xf32> -> vector<16x16xf32>
    %c0_150 = arith.constant 0 : index
    %c0_151 = arith.constant 0 : index
    %487 = vector.load %arg9[%c0_150, %c0_151] : memref<1x16xf32, #tpu.memory_space<vmem>>, vector<1x16xf32>
    %488 = vector.broadcast %487 : vector<1x16xf32> to vector<16x16xf32>
    %489 = arith.addf %486, %488 : vector<16x16xf32>
    %490 = math.tanh %489 : vector<16x16xf32>
    %c0_152 = arith.constant 0 : index
    %c0_153 = arith.constant 0 : index
    %491 = vector.load %arg10[%c0_152, %c0_153] : memref<16x1xf32, #tpu.memory_space<vmem>>, vector<16x1xf32>
    %cst_154 = arith.constant dense<0.000000e+00> : vector<16x1xf32>
    %492 = tpu.matmul %490, %491, %cst_154 {dimension_numbers = #tpu.dot_dimension_numbers<[1], [0], [0], [1], [0, 0, 1, 1], [], []>} : vector<16x16xf32>, vector<16x1xf32>, vector<16x1xf32> -> vector<16x1xf32>
    %c0_155 = arith.constant 0 : index
    %c0_156 = arith.constant 0 : index
    %493 = vector.load %arg11[%c0_155, %c0_156] : memref<1x1xf32, #tpu.memory_space<vmem>>, vector<1x1xf32>
    %494 = vector.broadcast %493 : vector<1x1xf32> to vector<16x1xf32>
    %495 = arith.addf %492, %494 : vector<16x1xf32>
    %496 = vector.extract_strided_slice %495 {offsets = [0, 0], sizes = [2, 1], strides = [1, 1]} : vector<16x1xf32> to vector<2x1xf32>
    %497 = vector.extract_strided_slice %495 {offsets = [2, 0], sizes = [2, 1], strides = [1, 1]} : vector<16x1xf32> to vector<2x1xf32>
    %498 = vector.extract_strided_slice %495 {offsets = [4, 0], sizes = [2, 1], strides = [1, 1]} : vector<16x1xf32> to vector<2x1xf32>
    %499 = vector.extract_strided_slice %495 {offsets = [6, 0], sizes = [2, 1], strides = [1, 1]} : vector<16x1xf32> to vector<2x1xf32>
    %500 = vector.extract_strided_slice %495 {offsets = [8, 0], sizes = [2, 1], strides = [1, 1]} : vector<16x1xf32> to vector<2x1xf32>
    %501 = vector.extract_strided_slice %495 {offsets = [10, 0], sizes = [2, 1], strides = [1, 1]} : vector<16x1xf32> to vector<2x1xf32>
    %502 = vector.extract_strided_slice %495 {offsets = [12, 0], sizes = [2, 1], strides = [1, 1]} : vector<16x1xf32> to vector<2x1xf32>
    %503 = vector.extract_strided_slice %495 {offsets = [14, 0], sizes = [2, 1], strides = [1, 1]} : vector<16x1xf32> to vector<2x1xf32>
    %504 = arith.maximumf %496, %497 : vector<2x1xf32>
    %505 = arith.maximumf %504, %498 : vector<2x1xf32>
    %506 = arith.maximumf %505, %499 : vector<2x1xf32>
    %507 = arith.maximumf %506, %500 : vector<2x1xf32>
    %508 = arith.maximumf %507, %501 : vector<2x1xf32>
    %509 = arith.maximumf %508, %502 : vector<2x1xf32>
    %510 = arith.maximumf %509, %503 : vector<2x1xf32>
    %511 = arith.subf %496, %510 : vector<2x1xf32>
    %512 = math.exp %511 : vector<2x1xf32>
    %513 = arith.subf %497, %510 : vector<2x1xf32>
    %514 = math.exp %513 : vector<2x1xf32>
    %515 = arith.subf %498, %510 : vector<2x1xf32>
    %516 = math.exp %515 : vector<2x1xf32>
    %517 = arith.subf %499, %510 : vector<2x1xf32>
    %518 = math.exp %517 : vector<2x1xf32>
    %519 = arith.subf %500, %510 : vector<2x1xf32>
    %520 = math.exp %519 : vector<2x1xf32>
    %521 = arith.subf %501, %510 : vector<2x1xf32>
    %522 = math.exp %521 : vector<2x1xf32>
    %523 = arith.subf %502, %510 : vector<2x1xf32>
    %524 = math.exp %523 : vector<2x1xf32>
    %525 = arith.subf %503, %510 : vector<2x1xf32>
    %526 = math.exp %525 : vector<2x1xf32>
    %527 = arith.addf %512, %514 : vector<2x1xf32>
    %528 = arith.addf %527, %516 : vector<2x1xf32>
    %529 = arith.addf %528, %518 : vector<2x1xf32>
    %530 = arith.addf %529, %520 : vector<2x1xf32>
    %531 = arith.addf %530, %522 : vector<2x1xf32>
    %532 = arith.addf %531, %524 : vector<2x1xf32>
    %533 = arith.addf %532, %526 : vector<2x1xf32>
    %cst_157 = arith.constant 1.000000e+00 : f32
    %534 = vector.broadcast %cst_157 : f32 to vector<2x1xf32>
    %535 = arith.divf %534, %533 : vector<2x1xf32>
    %536 = arith.mulf %512, %535 : vector<2x1xf32>
    %537 = vector.broadcast %536 : vector<2x1xf32> to vector<2x32xf32>
    %538 = arith.mulf %279, %537 : vector<2x32xf32>
    %539 = arith.mulf %514, %535 : vector<2x1xf32>
    %540 = vector.broadcast %539 : vector<2x1xf32> to vector<2x32xf32>
    %541 = arith.mulf %308, %540 : vector<2x32xf32>
    %542 = arith.addf %538, %541 : vector<2x32xf32>
    %543 = arith.mulf %516, %535 : vector<2x1xf32>
    %544 = vector.broadcast %543 : vector<2x1xf32> to vector<2x32xf32>
    %545 = arith.mulf %337, %544 : vector<2x32xf32>
    %546 = arith.addf %542, %545 : vector<2x32xf32>
    %547 = arith.mulf %518, %535 : vector<2x1xf32>
    %548 = vector.broadcast %547 : vector<2x1xf32> to vector<2x32xf32>
    %549 = arith.mulf %366, %548 : vector<2x32xf32>
    %550 = arith.addf %546, %549 : vector<2x32xf32>
    %551 = arith.mulf %520, %535 : vector<2x1xf32>
    %552 = vector.broadcast %551 : vector<2x1xf32> to vector<2x32xf32>
    %553 = arith.mulf %395, %552 : vector<2x32xf32>
    %554 = arith.addf %550, %553 : vector<2x32xf32>
    %555 = arith.mulf %522, %535 : vector<2x1xf32>
    %556 = vector.broadcast %555 : vector<2x1xf32> to vector<2x32xf32>
    %557 = arith.mulf %424, %556 : vector<2x32xf32>
    %558 = arith.addf %554, %557 : vector<2x32xf32>
    %559 = arith.mulf %524, %535 : vector<2x1xf32>
    %560 = vector.broadcast %559 : vector<2x1xf32> to vector<2x32xf32>
    %561 = arith.mulf %453, %560 : vector<2x32xf32>
    %562 = arith.addf %558, %561 : vector<2x32xf32>
    %563 = arith.mulf %526, %535 : vector<2x1xf32>
    %564 = vector.broadcast %563 : vector<2x1xf32> to vector<2x32xf32>
    %565 = arith.mulf %482, %564 : vector<2x32xf32>
    %566 = arith.addf %562, %565 : vector<2x32xf32>
    %c0_158 = arith.constant 0 : index
    %c0_159 = arith.constant 0 : index
    %567 = vector.load %arg12[%c0_158, %c0_159] : memref<32x16xf32, #tpu.memory_space<vmem>>, vector<32x16xf32>
    %cst_160 = arith.constant dense<0.000000e+00> : vector<2x16xf32>
    %568 = tpu.matmul %566, %567, %cst_160 {dimension_numbers = #tpu.dot_dimension_numbers<[1], [0], [0], [1], [0, 0, 1, 1], [], []>} : vector<2x32xf32>, vector<32x16xf32>, vector<2x16xf32> -> vector<2x16xf32>
    %c0_161 = arith.constant 0 : index
    %c0_162 = arith.constant 0 : index
    %569 = vector.load %arg13[%c0_161, %c0_162] : memref<1x16xf32, #tpu.memory_space<vmem>>, vector<1x16xf32>
    %570 = vector.broadcast %569 : vector<1x16xf32> to vector<2x16xf32>
    %571 = arith.addf %568, %570 : vector<2x16xf32>
    %cst_163 = arith.constant 0.000000e+00 : f32
    %572 = vector.broadcast %cst_163 : f32 to vector<2x16xf32>
    %573 = arith.maximumf %571, %572 : vector<2x16xf32>
    %c0_164 = arith.constant 0 : index
    %c0_165 = arith.constant 0 : index
    %574 = vector.load %arg14[%c0_164, %c0_165] : memref<16x8xf32, #tpu.memory_space<vmem>>, vector<16x8xf32>
    %cst_166 = arith.constant dense<0.000000e+00> : vector<2x8xf32>
    %575 = tpu.matmul %573, %574, %cst_166 {dimension_numbers = #tpu.dot_dimension_numbers<[1], [0], [0], [1], [0, 0, 1, 1], [], []>} : vector<2x16xf32>, vector<16x8xf32>, vector<2x8xf32> -> vector<2x8xf32>
    %c0_167 = arith.constant 0 : index
    %c0_168 = arith.constant 0 : index
    %576 = vector.load %arg15[%c0_167, %c0_168] : memref<1x8xf32, #tpu.memory_space<vmem>>, vector<1x8xf32>
    %577 = vector.broadcast %576 : vector<1x8xf32> to vector<2x8xf32>
    %578 = arith.addf %575, %577 : vector<2x8xf32>
    %c0_169 = arith.constant 0 : index
    %c0_170 = arith.constant 0 : index
    %579 = vector.load %arg16[%c0_169, %c0_170] : memref<2x8xf32, #tpu.memory_space<vmem>>, vector<2x8xf32>
    tpu.vector_store %arg16[%c0_169, %c0_170], %578 {strides = array<i32>} : memref<2x8xf32, #tpu.memory_space<vmem>>, vector<2x8xf32>,
    return
  }
  func.func @transform_0(%arg0: i32) -> (i32, i32) {
    %c0_i32 = arith.constant 0 : i32
    %c0_i32_0 = arith.constant 0 : i32
    %c0_i32_1 = arith.constant 0 : i32
    return %c0_i32, %c0_i32_0 : i32, i32
  }
  func.func @transform_1(%arg0: i32) -> (i32, i32) {
    %c0_i32 = arith.constant 0 : i32
    %c0_i32_0 = arith.constant 0 : i32
    %c0_i32_1 = arith.constant 0 : i32
    return %c0_i32, %c0_i32_0 : i32, i32
  }
  func.func @transform_2(%arg0: i32) -> (i32, i32) {
    %c0_i32 = arith.constant 0 : i32
    %c0_i32_0 = arith.constant 0 : i32
    %c0_i32_1 = arith.constant 0 : i32
    return %c0_i32, %c0_i32_0 : i32, i32
  }
  func.func @transform_3(%arg0: i32) -> (i32, i32) {
    %c0_i32 = arith.constant 0 : i32
    %c0_i32_0 = arith.constant 0 : i32
    %c0_i32_1 = arith.constant 0 : i32
    return %c0_i32, %c0_i32_0 : i32, i32
  }
  func.func @transform_4(%arg0: i32) -> (i32, i32) {
    %c0_i32 = arith.constant 0 : i32
    %c0_i32_0 = arith.constant 0 : i32
    %c0_i32_1 = arith.constant 0 : i32
    return %c0_i32, %c0_i32_0 : i32, i32
  }
  func.func @transform_5(%arg0: i32) -> (i32, i32) {
    %c0_i32 = arith.constant 0 : i32
    %c0_i32_0 = arith.constant 0 : i32
    %c0_i32_1 = arith.constant 0 : i32
    return %c0_i32, %c0_i32_0 : i32, i32
  }
  func.func @transform_6(%arg0: i32) -> (i32, i32) {
    %c0_i32 = arith.constant 0 : i32
    %c0_i32_0 = arith.constant 0 : i32
    %c0_i32_1 = arith.constant 0 : i32
    return %c0_i32, %c0_i32_0 : i32, i32
  }
  func.func @transform_7(%arg0: i32) -> (i32, i32) {
    %c0_i32 = arith.constant 0 : i32
    %c0_i32_0 = arith.constant 0 : i32
    %c0_i32_1 = arith.constant 0 : i32
    return %c0_i32, %c0_i32_0 : i32, i32
  }
  func.func @transform_8(%arg0: i32) -> (i32, i32) {
    %c0_i32 = arith.constant 0 : i32
    %c0_i32_0 = arith.constant 0 : i32
    %c0_i32_1 = arith.constant 0 : i32
    return %c0_i32, %c0_i32_0 : i32, i32
  }
  func.func @transform_9(%arg0: i32) -> (i32, i32) {
    %c0_i32 = arith.constant 0 : i32
    %c0_i32_0 = arith.constant 0 : i32
    %c0_i32_1 = arith.constant 0 : i32
    return %c0_i32, %c0_i32_0 : i32, i32
  }
  func.func @transform_10(%arg0: i32) -> (i32, i32) {
    %c0_i32 = arith.constant 0 : i32
    %c0_i32_0 = arith.constant 0 : i32
    %c0_i32_1 = arith.constant 0 : i32
    return %c0_i32, %c0_i32_0 : i32, i32
  }
  func.func @transform_11(%arg0: i32) -> (i32, i32) {
    %c0_i32 = arith.constant 0 : i32
    %c0_i32_0 = arith.constant 0 : i32
    %c0_i32_1 = arith.constant 0 : i32
    return %c0_i32, %c0_i32_0 : i32, i32
  }
  func.func @transform_12(%arg0: i32) -> (i32, i32) {
    %c0_i32 = arith.constant 0 : i32
    %c0_i32_0 = arith.constant 0 : i32
    %c0_i32_1 = arith.constant 0 : i32
    return %c0_i32, %c0_i32_0 : i32, i32
  }
  func.func @transform_13(%arg0: i32) -> (i32, i32) {
    %c0_i32 = arith.constant 0 : i32
    %c0_i32_0 = arith.constant 0 : i32
    %c0_i32_1 = arith.constant 0 : i32
    return %c0_i32, %c0_i32_0 : i32, i32
  }
  func.func @transform_14(%arg0: i32) -> (i32, i32) {
    %c0_i32 = arith.constant 0 : i32
    %c0_i32_0 = arith.constant 0 : i32
    %c0_i32_1 = arith.constant 0 : i32
    return %c0_i32, %c0_i32_0 : i32, i32
  }
  func.func @transform_15(%arg0: i32) -> (i32, i32) {
    %c0_i32 = arith.constant 0 : i32
    %c0_i32_0 = arith.constant 0 : i32
    %c0_i32_1 = arith.constant 0 : i32
    return %c0_i32, %c0_i32_0 : i32, i32
  }
}

</mosaic_0001>

<bundles_post_ra>
// kernel: skeleton_lstm_forward.1
= control target key start
LH: loop header
LB: loop body
LE: loop exit
PB: predicated region body
PF: predicated region fallthrough
CT: control target
= control target key end

     0   :  { %s3605_s0 = inlined_call_operand.vmem [shape: f32[16,34], index: 0, kind: input, shape index: {}]   ;;  %s3606_s1 = inlined_call_operand.vmem [shape: f32[34,128], index: 1, kind: input, shape index: {}]   ;;  %s3607_s2 = inlined_call_operand.vmem [shape: f32[32,128], index: 2, kind: input, shape index: {}]   ;;  %s3608_s3 = inlined_call_operand.vmem [shape: f32[1,128], index: 3, kind: input, shape index: {}]   ;;  %s3609_s4 = inlined_call_operand.vmem [shape: f32[32,128], index: 4, kind: input, shape index: {}]   ;;  %s3610_s5 = inlined_call_operand.vmem [shape: f32[32,128], index: 5, kind: input, shape index: {}]   ;;  %s3611_s6 = inlined_call_operand.vmem [shape: f32[1,128], index: 6, kind: input, shape index: {}]   ;;  %s3612_s7 = inlined_call_operand.vmem [shape: f32[32,16], index: 7, kind: input, shape index: {}]   ;;  %s3613_s8 = inlined_call_operand.vmem [shape: f32[1,16], index: 8, kind: input, shape index: {}]   ;;  %s3614_s9 = inlined_call_operand.vmem [shape: f32[16,1], index: 9, kind: input, shape index: {}]   ;;  %s3615_s10 = inlined_call_operand.<no memory space> [shape: f32[1,1], index: 10, kind: input, shape index: {}]   ;;  %s3616_s11 = inlined_call_operand.vmem [shape: f32[32,16], index: 11, kind: input, shape index: {}]   ;;  %s3617_s12 = inlined_call_operand.vmem [shape: f32[1,16], index: 12, kind: input, shape index: {}]   ;;  %s3618_s13 = inlined_call_operand.vmem [shape: f32[16,8], index: 13, kind: input, shape index: {}]   ;;  %s3619_s14 = inlined_call_operand.vmem [shape: f32[1,8], index: 14, kind: input, shape index: {}]   ;;  %s3620_s15 = inlined_call_operand.hbm [shape: f32[2,8], index: 15, kind: output, shape index: {}]  }
   0x1   :  { %v20_v0 = vstv %s3615_s10 }
   0x2   :  { %21 = vst [vmem:[#allocation4] sm:$0x1] %v20_v0 }
   0x3   :  { %v53_v1 = vld [vmem:[%s3606_s1] sm:$0xff]  ;;  %v54_v2 = vld [vmem:[%s3606_s1 + $0x8] sm:$0xff]  ;;  %v55_v3 = vld [vmem:[%s3606_s1 + $0x10] sm:$0xff]  ;;  %vm71_vm0 = vcmask 277504   ;;  %v3145_v7 = vmov 0.0|0.0   ;;  %vm3146_vm1 = vmmov 0  }
   0x4   :  { %v2829_v4 = vpack.c.bf16 %v54_v2, %v53_v1  ;;  %v56_v5 = vld [vmem:[%s3606_s1 + $0x18] sm:$0xff]  ;;  %v63_v6 = vld [vmem:[%s3605_s0] sm:$0xff]  ;;  %2837 = vmatprep.subr.bf16.mxu1 %v3145_v7  ;;  %v59_v10 = vld [vmem:[%s3607_s2 + $0x8] sm:$0xff]  ;;  %v3147_v11 = vmov 0.0  }
   0x5   :  { %v2833_v8 = vpack.c.bf16 %v56_v5, %v55_v3  ;;  %2603 = vmatprep.mubr.msk.f32.mxu0 %vm71_vm0, %v63_v6  ;;  %v58_v9 = vld [vmem:[%s3607_s2] sm:$0xff]  ;;  %2614 = vmatprep.mubr.msk.f32.mxu1 %vm3146_vm1, %v3147_v11  ;;  %v60_v13 = vld [vmem:[%s3607_s2 + $0x10] sm:$0xff]  ;;  %v61_v14 = vld [vmem:[%s3607_s2 + $0x18] sm:$0xff] }
   0x6   :  { %2830 = vmatprep.subr.bf16.mxu0 %v2829_v4  ;;  %v3260_v12 = vpack.c.bf16 %v59_v10, %v58_v9 }
   0x7   :  { %22 = vsyncpa [#allocation6], 0  ;;  %2832 = vmatpush3.bf16.msra.mxu0 %v2829_v4  ;;  %v3269_v15 = vpack.c.bf16 %v61_v14, %v60_v13  ;;  %v57_v16 = vld [vmem:[%s3606_s1 + $0x20] sm:$0x3]  ;;  %vm78_vm2 = vcmask 1041408   ;;  %v64_v17 = vld [vmem:[%s3605_s0 + $0x8] sm:$0xff] }
   0x8   :  { %2834 = vmatprep.subr.bf16.mxu0 %v2833_v8  ;;  %2839 = vmatpush3.bf16.msra.mxu1 %v3260_v12  ;;  %v2435_v18 = vld [vmem:[%s3608_s3] ss:$0 sm:$0xff]  ;;  %s3148_s25 = smov 64   ;;  %s3149_s3 = smov 32   ;;  %vm263_vm3 = vcmask 254976   ;;  %vm160_vm4 = vcmask 261120  }
   0x9   :  { %2840 = vmatprep.subr.bf16.mxu1 %v3145_v7  ;;  %vm2013_vm5 = vcmask 130048   ;;  %s3151_s26 = smov [#allocation5]   ;;  %vm2419_vm6 = vcmask 58368  }
   0xa   :  { %s2427_s27 = sshll.u32 %s3151_s26, 4  ;;  %s2428_s27 = int_to_ptr.vmem [resolvable:$true] %s2427_s27 }
   0xb   :  { %2836 = vmatpush3.bf16.msra.mxu0 %v2833_v8  ;;  %p3126_p1 = scmp.lt.s32.totalorder %s2428_s27, %s2428_s27 }
   0xc   :  { %2601 = vmatprep.subr.msk.mxu0 %vm78_vm2, %v57_v16  ;;  %2842 = vmatpush3.bf16.msra.mxu1 %v3269_v15 }
   0xd   :  { %2843 = vmatprep.subr.bf16.mxu1 %v3145_v7 }
   0xf   :  { %2602 = vmatpush3.msk.msra.mxu0 %vm78_vm2, %v57_v16  ;;  %2615 = vmatmul.mubr.f32.vlgmr.msra.gmra.mrb[0].mxu1 %v3147_v11 }
  0x10   :  { %2604 = vmatmul.mubr.msk.f32.vlgmr.msra.gmra.mrb[0].mxu0 %vm71_vm0, %v64_v17  ;;  %2845 = vmatpush3.bf16.msra.mxu1 %v3260_v12 }
  0x11   :  { %2846 = vmatprep.subr.bf16.mxu1 %v3145_v7  ;;  %2625 = vmatprep.mubr.msk.f32.mxu1 %vm3146_vm1, %v3147_v11 }
  0x12   :  { %2849 = vmatprep.subr.bf16.mxu0 %v3145_v7  ;;  %2636 = vmatprep.mubr.msk.f32.mxu0 %vm3146_vm1, %v3147_v11 }
  0x13   :  { %2851 = vmatpush3.bf16.msra.mxu0 %v3260_v12 }
  0x14   :  { %2848 = vmatpush3.bf16.msra.mxu1 %v3269_v15  ;;  %2852 = vmatprep.subr.bf16.mxu0 %v3145_v7 }
  0x15   :  { %2855 = vmatprep.subr.bf16.mxu1 %v3145_v7 }
  0x17   :  { %2854 = vmatpush3.bf16.msra.mxu0 %v3269_v15 }
  0x18   :  { %2861 = vmatprep.subr.bf16.mxu0 %v3145_v7 }
  0xe2   :  { %v230_v19 = vpop.f32.mrb[0].mxu1 }
  0xe3   :  { %v2605_v20 = vpop.f32.mrb[0].mxu0  ;;  %v2616_v21 = vpop.f32.mrb[1].mxu1 }
  0xe4   :  { %v154_v22 = vadd.f32 %v2605_v20, %v2435_v18  ;;  %v148_v23 = vpop.f32.mrb[1].mxu0 }
  0xe5   :  { %v149_v24 = vadd.f32 %v2435_v18, %v148_v23 }
  0xe6   :  { %158 = vst [vmem:[#allocation2 + $0x8] sm:$0xff] %v154_v22 }
  0xe7   :  { %157 = vst [vmem:[#allocation2] sm:$0xff] %v149_v24 }
  0xee   :  { %v159_v25 = vld [vmem:[#allocation2] sm:$0x3]  ;;  %v265_v41 = vld [vmem:[#allocation2 + $0x2] sm:$0x3]  ;;  %v368_v59 = vld [vmem:[#allocation2 + $0x4] sm:$0x3] }
  0xef   :  { %v234_v26 = vadd.f32 %v230_v19, %v159_v25  ;;  %v471_v17 = vld [vmem:[#allocation2 + $0x6] sm:$0x3] }
  0xf1   :  { %2971 = vtanh.f32 %v234_v26  ;;  %v2439_v28 = vmul.f32 -1.442695, %v234_v26 }
  0xf3   :  { %2973 = vpow2.f32 %v2439_v28 }
  0xfb   :  { %v2972_v27 = vpop.eup %2971 }
  0xfc   :  { %244 = vrot.lane.b32.xlu0 %v2972_v27, %s3148_s25 }
  0xfd   :  { %v2974_v29 = vpop.eup %2973 }
  0xfe   :  { %v238_v30 = vadd.f32 1.0, %v2974_v29 }
 0x100   :  { %2975 = vrcp.f32 %v238_v30 }
 0x10a   :  { %v2976_v31 = vpop.eup %2975 }
 0x10b   :  { %v242_v34 = vmul.f32 0.0, %v2976_v31 }
 0x16e   :  { %v245_v32 = vpop.permute.xlu0 %244 }
 0x16f   :  { %v247_v33 = vmul.f32 %v2976_v31, %v245_v32 }
 0x171   :  { %249 = vrot.lane.b32.xlu0 %v247_v33, %s3149_s3 }
 0x1e3   :  { %v250_v35 = vpop.permute.xlu0 %249 }
 0x1e4   :  { %v252_v36 = vadd.f32 %v250_v35, %v242_v34  ;;  %v574_v35 = vld [vmem:[#allocation2 + $0x8] sm:$0x3] }
 0x1e6   :  { %2977 = vtanh.f32 %v252_v36 }
 0x1f0   :  { %v2978_v37 = vpop.eup %2977 }
 0x1f1   :  { %255 = vrot.lane.b32.xlu1 %v2978_v37, %s3148_s25 }
 0x263   :  { %v256_v38 = vpop.permute.xlu1 %255 }
 0x264   :  { %v258_v39 = vmul.f32 %v2976_v31, %v256_v38 }
 0x266   :  { %260 = vrot.lane.b32.xlu1 %v258_v39, %s3149_s3 }
 0x2d8   :  { %v261_v40 = vpop.permute.xlu1 %260 }
 0x2d9   :  { %264 = vst.msk [vmem:[#allocation3] sm:$0x3] %vm263_vm3, %v261_v40  ;;  %2626 = vmatmul.mubr.msk.f32.vlgmr.msra.gmra.mrb[2].mxu1 %vm160_vm4, %v261_v40 }
 0x2da   :  { %2857 = vmatpush3.bf16.msra.mxu1 %v3260_v12  ;;  %2647 = vmatprep.mubr.msk.f32.mxu1 %vm3146_vm1, %v3147_v11 }
 0x2db   :  { %2858 = vmatprep.subr.bf16.mxu1 %v3145_v7 }
 0x2de   :  { %2860 = vmatpush3.bf16.msra.mxu1 %v3269_v15 }
 0x2df   :  { %2867 = vmatprep.subr.bf16.mxu1 %v3145_v7 }
 0x3ac   :  { %v334_v42 = vpop.f32.mrb[2].mxu1 }
 0x3ad   :  { %v338_v43 = vadd.f32 %v334_v42, %v265_v41  ;;  %v2627_v44 = vpop.f32.mrb[3].mxu1 }
 0x3af   :  { %2979 = vtanh.f32 %v338_v43  ;;  %v2441_v46 = vmul.f32 -1.442695, %v338_v43 }
 0x3b1   :  { %2981 = vpow2.f32 %v2441_v46 }
 0x3b9   :  { %v2980_v45 = vpop.eup %2979 }
 0x3ba   :  { %348 = vrot.lane.b32.xlu0 %v2980_v45, %s3148_s25 }
 0x3bb   :  { %v2982_v47 = vpop.eup %2981 }
 0x3bc   :  { %v342_v48 = vadd.f32 1.0, %v2982_v47 }
 0x3be   :  { %2983 = vrcp.f32 %v342_v48 }
 0x3c8   :  { %v2984_v49 = vpop.eup %2983 }
 0x3c9   :  { %v346_v52 = vmul.f32 %v2984_v49, %v252_v36 }
 0x42c   :  { %v349_v50 = vpop.permute.xlu0 %348 }
 0x42d   :  { %v351_v51 = vmul.f32 %v2984_v49, %v349_v50 }
 0x42f   :  { %353 = vrot.lane.b32.xlu1 %v351_v51, %s3149_s3 }
 0x4a1   :  { %v354_v53 = vpop.permute.xlu1 %353 }
 0x4a2   :  { %v356_v54 = vadd.f32 %v354_v53, %v346_v52  ;;  %v677_v53 = vld [vmem:[#allocation2 + $0xa] sm:$0x3] }
 0x4a4   :  { %2985 = vtanh.f32 %v356_v54 }
 0x4ae   :  { %v2986_v55 = vpop.eup %2985 }
 0x4af   :  { %359 = vrot.lane.b32.xlu0 %v2986_v55, %s3148_s25 }
 0x521   :  { %v360_v56 = vpop.permute.xlu0 %359 }
 0x522   :  { %v362_v57 = vmul.f32 %v2984_v49, %v360_v56 }
 0x524   :  { %364 = vrot.lane.b32.xlu1 %v362_v57, %s3149_s3 }
 0x596   :  { %v365_v58 = vpop.permute.xlu1 %364 }
 0x597   :  { %367 = vst.msk [vmem:[#allocation3 + $0x2] sm:$0x3] %vm263_vm3, %v365_v58  ;;  %2637 = vmatmul.mubr.msk.f32.vlgmr.msra.gmra.mrb[2].mxu0 %vm160_vm4, %v365_v58 }
 0x598   :  { %2863 = vmatpush3.bf16.msra.mxu0 %v3260_v12  ;;  %2658 = vmatprep.mubr.msk.f32.mxu0 %vm3146_vm1, %v3147_v11 }
 0x599   :  { %2864 = vmatprep.subr.bf16.mxu0 %v3145_v7 }
 0x59c   :  { %2866 = vmatpush3.bf16.msra.mxu0 %v3269_v15 }
 0x59d   :  { %2873 = vmatprep.subr.bf16.mxu0 %v3145_v7 }
 0x66a   :  { %v437_v60 = vpop.f32.mrb[2].mxu0 }
 0x66b   :  { %v441_v61 = vadd.f32 %v437_v60, %v368_v59  ;;  %v2638_v62 = vpop.f32.mrb[3].mxu0 }
 0x66d   :  { %2987 = vtanh.f32 %v441_v61  ;;  %v2443_v0 = vmul.f32 -1.442695, %v441_v61 }
 0x66f   :  { %2989 = vpow2.f32 %v2443_v0 }
 0x677   :  { %v2988_v63 = vpop.eup %2987 }
 0x678   :  { %451 = vrot.lane.b32.xlu0 %v2988_v63, %s3148_s25 }
 0x679   :  { %v2990_v1 = vpop.eup %2989 }
 0x67a   :  { %v445_v2 = vadd.f32 1.0, %v2990_v1 }
 0x67c   :  { %2991 = vrcp.f32 %v445_v2 }
 0x686   :  { %v2992_v3 = vpop.eup %2991 }
 0x687   :  { %v449_v6 = vmul.f32 %v2992_v3, %v356_v54 }
 0x6ea   :  { %v452_v4 = vpop.permute.xlu0 %451 }
 0x6eb   :  { %v454_v5 = vmul.f32 %v2992_v3, %v452_v4 }
 0x6ed   :  { %456 = vrot.lane.b32.xlu1 %v454_v5, %s3149_s3 }
 0x75f   :  { %v457_v8 = vpop.permute.xlu1 %456 }
 0x760   :  { %v459_v9 = vadd.f32 %v457_v8, %v449_v6  ;;  %v780_v6 = vld [vmem:[#allocation2 + $0xc] sm:$0x3] }
 0x762   :  { %2993 = vtanh.f32 %v459_v9 }
 0x76c   :  { %v2994_v10 = vpop.eup %2993 }
 0x76d   :  { %462 = vrot.lane.b32.xlu0 %v2994_v10, %s3148_s25 }
 0x7df   :  { %v463_v13 = vpop.permute.xlu0 %462 }
 0x7e0   :  { %v465_v14 = vmul.f32 %v2992_v3, %v463_v13 }
 0x7e2   :  { %467 = vrot.lane.b32.xlu1 %v465_v14, %s3149_s3 }
 0x854   :  { %v468_v16 = vpop.permute.xlu1 %467 }
 0x855   :  { %470 = vst.msk [vmem:[#allocation3 + $0x4] sm:$0x3] %vm263_vm3, %v468_v16  ;;  %2648 = vmatmul.mubr.msk.f32.vlgmr.msra.gmra.mrb[4].mxu1 %vm160_vm4, %v468_v16 }
 0x856   :  { %2869 = vmatpush3.bf16.msra.mxu1 %v3260_v12  ;;  %2669 = vmatprep.mubr.msk.f32.mxu1 %vm3146_vm1, %v3147_v11 }
 0x857   :  { %2870 = vmatprep.subr.bf16.mxu1 %v3145_v7 }
 0x85a   :  { %2872 = vmatpush3.bf16.msra.mxu1 %v3269_v15 }
 0x85b   :  { %2879 = vmatprep.subr.bf16.mxu1 %v3145_v7 }
 0x928   :  { %v540_v18 = vpop.f32.mrb[4].mxu1 }
 0x929   :  { %v544_v19 = vadd.f32 %v540_v18, %v471_v17  ;;  %v2649_v20 = vpop.f32.mrb[5].mxu1 }
 0x92b   :  { %2995 = vtanh.f32 %v544_v19  ;;  %v2445_v22 = vmul.f32 -1.442695, %v544_v19 }
 0x92d   :  { %2997 = vpow2.f32 %v2445_v22 }
 0x935   :  { %v2996_v21 = vpop.eup %2995 }
 0x936   :  { %554 = vrot.lane.b32.xlu0 %v2996_v21, %s3148_s25 }
 0x937   :  { %v2998_v23 = vpop.eup %2997 }
 0x938   :  { %v548_v24 = vadd.f32 1.0, %v2998_v23 }
 0x93a   :  { %2999 = vrcp.f32 %v548_v24 }
 0x944   :  { %v3000_v25 = vpop.eup %2999 }
 0x945   :  { %v552_v28 = vmul.f32 %v3000_v25, %v459_v9 }
 0x9a8   :  { %v555_v26 = vpop.permute.xlu0 %554 }
 0x9a9   :  { %v557_v27 = vmul.f32 %v3000_v25, %v555_v26 }
 0x9ab   :  { %559 = vrot.lane.b32.xlu1 %v557_v27, %s3149_s3 }
 0xa1d   :  { %v560_v29 = vpop.permute.xlu1 %559 }
 0xa1e   :  { %v562_v30 = vadd.f32 %v560_v29, %v552_v28  ;;  %v883_v28 = vld [vmem:[#allocation2 + $0xe] sm:$0x3] }
 0xa20   :  { %3001 = vtanh.f32 %v562_v30 }
 0xa2a   :  { %v3002_v31 = vpop.eup %3001 }
 0xa2b   :  { %565 = vrot.lane.b32.xlu0 %v3002_v31, %s3148_s25 }
 0xa9d   :  { %v566_v32 = vpop.permute.xlu0 %565 }
 0xa9e   :  { %v568_v33 = vmul.f32 %v3000_v25, %v566_v32 }
 0xaa0   :  { %570 = vrot.lane.b32.xlu1 %v568_v33, %s3149_s3 }
 0xb12   :  { %v571_v34 = vpop.permute.xlu1 %570 }
 0xb13   :  { %573 = vst.msk [vmem:[#allocation3 + $0x6] sm:$0x3] %vm263_vm3, %v571_v34  ;;  %2659 = vmatmul.mubr.msk.f32.vlgmr.msra.gmra.mrb[4].mxu0 %vm160_vm4, %v571_v34 }
 0xb14   :  { %2875 = vmatpush3.bf16.msra.mxu0 %v3260_v12  ;;  %2680 = vmatprep.mubr.msk.f32.mxu0 %vm3146_vm1, %v3147_v11 }
 0xb15   :  { %2876 = vmatprep.subr.bf16.mxu0 %v3145_v7 }
 0xb18   :  { %2878 = vmatpush3.bf16.msra.mxu0 %v3269_v15 }
 0xb1a   :  { %v995_v5 = vld [vmem:[#allocation3] sm:$0xff] }
 0xbe6   :  { %v643_v36 = vpop.f32.mrb[4].mxu0 }
 0xbe7   :  { %v647_v37 = vadd.f32 %v643_v36, %v574_v35  ;;  %v2660_v38 = vpop.f32.mrb[5].mxu0 }
 0xbe9   :  { %3003 = vtanh.f32 %v647_v37  ;;  %v2447_v40 = vmul.f32 -1.442695, %v647_v37 }
 0xbeb   :  { %3005 = vpow2.f32 %v2447_v40 }
 0xbf3   :  { %v3004_v39 = vpop.eup %3003 }
 0xbf4   :  { %657 = vrot.lane.b32.xlu0 %v3004_v39, %s3148_s25 }
 0xbf5   :  { %v3006_v41 = vpop.eup %3005 }
 0xbf6   :  { %v651_v42 = vadd.f32 1.0, %v3006_v41 }
 0xbf8   :  { %3007 = vrcp.f32 %v651_v42 }
 0xc02   :  { %v3008_v43 = vpop.eup %3007 }
 0xc03   :  { %v655_v46 = vmul.f32 %v3008_v43, %v562_v30 }
 0xc66   :  { %v658_v44 = vpop.permute.xlu0 %657 }
 0xc67   :  { %v660_v45 = vmul.f32 %v3008_v43, %v658_v44  ;;  %v987_v44 = vld [vmem:[%s3609_s4 + $0x8] sm:$0xff] }
 0xc69   :  { %662 = vrot.lane.b32.xlu1 %v660_v45, %s3149_s3 }
 0xcdb   :  { %v663_v47 = vpop.permute.xlu1 %662 }
 0xcdc   :  { %v665_v48 = vadd.f32 %v663_v47, %v655_v46  ;;  %v988_v46 = vld [vmem:[%s3609_s4 + $0x10] sm:$0xff]  ;;  %v989_v47 = vld [vmem:[%s3609_s4 + $0x18] sm:$0xff] }
 0xcde   :  { %3009 = vtanh.f32 %v665_v48 }
 0xce8   :  { %v3010_v49 = vpop.eup %3009 }
 0xce9   :  { %668 = vrot.lane.b32.xlu0 %v3010_v49, %s3148_s25  ;;  %v990_v49 = vld [vmem:[%s3610_s5] sm:$0xff] }
 0xd5b   :  { %v669_v50 = vpop.permute.xlu0 %668 }
 0xd5c   :  { %v671_v51 = vmul.f32 %v3008_v43, %v669_v50  ;;  %v986_v43 = vld [vmem:[%s3609_s4] sm:$0xff]  ;;  %v991_v50 = vld [vmem:[%s3610_s5 + $0x8] sm:$0xff] }
 0xd5d   :  { %v2885_v45 = vpack.c.bf16 %v987_v44, %v986_v43 }
 0xd5e   :  { %673 = vrot.lane.b32.xlu1 %v671_v51, %s3149_s3  ;;  %v992_v51 = vld [vmem:[%s3610_s5 + $0x10] sm:$0xff] }
 0xd5f   :  { %2886 = vmatprep.subr.bf16.mxu0 %v2885_v45 }
 0xdd0   :  { %v674_v52 = vpop.permute.xlu1 %673 }
 0xdd1   :  { %676 = vst.msk [vmem:[#allocation3 + $0x8] sm:$0x3] %vm263_vm3, %v674_v52  ;;  %2670 = vmatmul.mubr.msk.f32.vlgmr.msra.gmra.mrb[6].mxu1 %vm160_vm4, %v674_v52  ;;  %v3397_v52 = vpack.c.bf16 %v991_v50, %v990_v49 }
 0xdd2   :  { %2881 = vmatpush3.bf16.msra.mxu1 %v3260_v12  ;;  %2691 = vmatprep.mubr.msk.f32.mxu1 %vm3146_vm1, %v3147_v11 }
 0xdd3   :  { %2882 = vmatprep.subr.bf16.mxu1 %v3145_v7 }
 0xdd6   :  { %2884 = vmatpush3.bf16.msra.mxu1 %v3269_v15 }
 0xdd7   :  { %2893 = vmatprep.subr.bf16.mxu1 %v3145_v7 }
 0xea4   :  { %v746_v54 = vpop.f32.mrb[6].mxu1 }
 0xea5   :  { %v750_v55 = vadd.f32 %v746_v54, %v677_v53  ;;  %v2671_v56 = vpop.f32.mrb[7].mxu1  ;;  %v993_v53 = vld [vmem:[%s3610_s5 + $0x18] sm:$0xff] }
 0xea6   :  { %v3403_v56 = vpack.c.bf16 %v993_v53, %v992_v51 }
 0xea7   :  { %3011 = vtanh.f32 %v750_v55  ;;  %v2449_v58 = vmul.f32 -1.442695, %v750_v55 }
 0xea9   :  { %3013 = vpow2.f32 %v2449_v58 }
 0xeb1   :  { %v3012_v57 = vpop.eup %3011 }
 0xeb2   :  { %760 = vrot.lane.b32.xlu0 %v3012_v57, %s3148_s25 }
 0xeb3   :  { %v3014_v12 = vpop.eup %3013 }
 0xeb4   :  { %v754_v59 = vadd.f32 1.0, %v3014_v12 }
 0xeb6   :  { %3015 = vrcp.f32 %v754_v59 }
 0xec0   :  { %v3016_v60 = vpop.eup %3015 }
 0xec1   :  { %v758_v15 = vmul.f32 %v3016_v60, %v665_v48  ;;  %v2889_v48 = vpack.c.bf16 %v989_v47, %v988_v46 }
 0xf24   :  { %v761_v61 = vpop.permute.xlu0 %760 }
 0xf25   :  { %v763_v62 = vmul.f32 %v3016_v60, %v761_v61 }
 0xf27   :  { %765 = vrot.lane.b32.xlu1 %v763_v62, %s3149_s3 }
 0xf99   :  { %v766_v63 = vpop.permute.xlu1 %765 }
 0xf9a   :  { %v768_v0 = vadd.f32 %v766_v63, %v758_v15 }
 0xf9c   :  { %3017 = vtanh.f32 %v768_v0 }
 0xfa6   :  { %v3018_v1 = vpop.eup %3017 }
 0xfa7   :  { %771 = vrot.lane.b32.xlu0 %v3018_v1, %s3148_s25 }
0x1019   :  { %v772_v2 = vpop.permute.xlu0 %771 }
0x101a   :  { %v774_v3 = vmul.f32 %v3016_v60, %v772_v2  ;;  %v2454_v60 = vld [vmem:[%s3611_s6] ss:$0 sm:$0xff] }
0x101c   :  { %776 = vrot.lane.b32.xlu1 %v774_v3, %s3149_s3 }
0x108e   :  { %v777_v4 = vpop.permute.xlu1 %776 }
0x108f   :  { %779 = vst.msk [vmem:[#allocation3 + $0xa] sm:$0x3] %vm263_vm3, %v777_v4  ;;  %2681 = vmatmul.mubr.msk.f32.vlgmr.msra.gmra.mrb[6].mxu0 %vm160_vm4, %v777_v4 }
0x1090   :  { %2702 = vmatprep.mubr.msk.f32.mxu0 %vm160_vm4, %v995_v5  ;;  %2888 = vmatpush3.bf16.msra.mxu0 %v2885_v45 }
0x1091   :  { %2890 = vmatprep.subr.bf16.mxu0 %v2889_v48 }
0x1094   :  { %2892 = vmatpush3.bf16.msra.mxu0 %v2889_v48 }
0x1095   :  { %2899 = vmatprep.subr.bf16.mxu0 %v3145_v7 }
0x1162   :  { %v849_v8 = vpop.f32.mrb[6].mxu0 }
0x1163   :  { %v853_v9 = vadd.f32 %v849_v8, %v780_v6  ;;  %v2682_v10 = vpop.f32.mrb[7].mxu0 }
0x1165   :  { %3019 = vtanh.f32 %v853_v9  ;;  %v2451_v14 = vmul.f32 -1.442695, %v853_v9 }
0x1167   :  { %3021 = vpow2.f32 %v2451_v14 }
0x116f   :  { %v3020_v13 = vpop.eup %3019 }
0x1170   :  { %863 = vrot.lane.b32.xlu0 %v3020_v13, %s3148_s25 }
0x1171   :  { %v3022_v16 = vpop.eup %3021 }
0x1172   :  { %v857_v17 = vadd.f32 1.0, %v3022_v16 }
0x1174   :  { %3023 = vrcp.f32 %v857_v17 }
0x117e   :  { %v3024_v18 = vpop.eup %3023 }
0x117f   :  { %v861_v21 = vmul.f32 %v3024_v18, %v768_v0 }
0x11e2   :  { %v864_v19 = vpop.permute.xlu0 %863 }
0x11e3   :  { %v866_v20 = vmul.f32 %v3024_v18, %v864_v19 }
0x11e5   :  { %868 = vrot.lane.b32.xlu1 %v866_v20, %s3149_s3 }
0x1257   :  { %v869_v22 = vpop.permute.xlu1 %868 }
0x1258   :  { %v871_v23 = vadd.f32 %v869_v22, %v861_v21 }
0x125a   :  { %3025 = vtanh.f32 %v871_v23 }
0x1264   :  { %v3026_v24 = vpop.eup %3025 }
0x1265   :  { %874 = vrot.lane.b32.xlu0 %v3026_v24, %s3148_s25 }
0x12d7   :  { %v875_v25 = vpop.permute.xlu0 %874 }
0x12d8   :  { %v877_v26 = vmul.f32 %v3024_v18, %v875_v25 }
0x12da   :  { %879 = vrot.lane.b32.xlu1 %v877_v26, %s3149_s3 }
0x134c   :  { %v880_v27 = vpop.permute.xlu1 %879 }
0x134d   :  { %882 = vst.msk [vmem:[#allocation3 + $0xc] sm:$0x3] %vm263_vm3, %v880_v27  ;;  %2692 = vmatmul.mubr.msk.f32.vlgmr.msra.gmra.mrb[8].mxu1 %vm160_vm4, %v880_v27 }
0x134e   :  { %2713 = vmatprep.mubr.msk.f32.mxu1 %vm3146_vm1, %v3147_v11  ;;  %2895 = vmatpush3.bf16.msra.mxu1 %v3397_v52 }
0x134f   :  { %2896 = vmatprep.subr.bf16.mxu1 %v3145_v7 }
0x1352   :  { %2898 = vmatpush3.bf16.msra.mxu1 %v3403_v56 }
0x1353   :  { %2905 = vmatprep.subr.bf16.mxu1 %v3145_v7 }
0x1355   :  { %2714 = vmatmul.mubr.f32.vlgmr.msra.gmra.mrb[10].mxu1 %v3147_v11 }
0x1356   :  { %2907 = vmatpush3.bf16.msra.mxu1 %v3397_v52  ;;  %2735 = vmatprep.mubr.msk.f32.mxu1 %vm3146_vm1, %v3147_v11 }
0x1357   :  { %2908 = vmatprep.subr.bf16.mxu1 %v3145_v7 }
0x135a   :  { %2910 = vmatpush3.bf16.msra.mxu1 %v3403_v56 }
0x135b   :  { %2917 = vmatprep.subr.bf16.mxu1 %v3145_v7 }
0x1420   :  { %v952_v29 = vpop.f32.mrb[8].mxu1 }
0x1421   :  { %v956_v30 = vadd.f32 %v952_v29, %v883_v28  ;;  %v2693_v31 = vpop.f32.mrb[9].mxu1 }
0x1423   :  { %3027 = vtanh.f32 %v956_v30  ;;  %v2453_v33 = vmul.f32 -1.442695, %v956_v30 }
0x1425   :  { %3029 = vpow2.f32 %v2453_v33 }
0x1428   :  { %v1153_v12 = vpop.f32.mrb[10].mxu1 }
0x1429   :  { %v2715_v59 = vpop.f32.mrb[11].mxu1 }
0x142d   :  { %v3028_v32 = vpop.eup %3027 }
0x142e   :  { %966 = vrot.lane.b32.xlu0 %v3028_v32, %s3148_s25 }
0x142f   :  { %v3030_v34 = vpop.eup %3029 }
0x1430   :  { %v960_v35 = vadd.f32 1.0, %v3030_v34 }
0x1432   :  { %3031 = vrcp.f32 %v960_v35 }
0x143c   :  { %v3032_v36 = vpop.eup %3031 }
0x143d   :  { %v964_v39 = vmul.f32 %v3032_v36, %v871_v23 }
0x14a0   :  { %v967_v37 = vpop.permute.xlu0 %966 }
0x14a1   :  { %v969_v38 = vmul.f32 %v3032_v36, %v967_v37 }
0x14a3   :  { %971 = vrot.lane.b32.xlu1 %v969_v38, %s3149_s3 }
0x1515   :  { %v972_v40 = vpop.permute.xlu1 %971 }
0x1516   :  { %v974_v41 = vadd.f32 %v972_v40, %v964_v39 }
0x1518   :  { %3033 = vtanh.f32 %v974_v41 }
0x1522   :  { %v3034_v42 = vpop.eup %3033 }
0x1523   :  { %977 = vrot.lane.b32.xlu0 %v3034_v42, %s3148_s25 }
0x1595   :  { %v978_v54 = vpop.permute.xlu0 %977 }
0x1596   :  { %v980_v55 = vmul.f32 %v3032_v36, %v978_v54 }
0x1598   :  { %982 = vrot.lane.b32.xlu1 %v980_v55, %s3149_s3 }
0x160a   :  { %v983_v57 = vpop.permute.xlu1 %982 }
0x160b   :  { %985 = vst.msk [vmem:[#allocation3 + $0xe] sm:$0x3] %vm263_vm3, %v983_v57 }
0x1612   :  { %v996_v58 = vld [vmem:[#allocation3 + $0x8] sm:$0xff] }
0x1613   :  { %2703 = vmatmul.mubr.msk.f32.vlgmr.msra.gmra.mrb[8].mxu0 %vm160_vm4, %v996_v58 }
0x1614   :  { %2901 = vmatpush3.bf16.msra.mxu0 %v3397_v52  ;;  %2724 = vmatprep.mubr.msk.f32.mxu0 %vm3146_vm1, %v3147_v11 }
0x1615   :  { %2902 = vmatprep.subr.bf16.mxu0 %v3145_v7 }
0x1618   :  { %2904 = vmatpush3.bf16.msra.mxu0 %v3403_v56 }
0x1619   :  { %2911 = vmatprep.subr.bf16.mxu0 %v3145_v7 }
0x16e6   :  { %v2704_v61 = vpop.f32.mrb[8].mxu0 }
0x16e7   :  { %v1081_v62 = vadd.f32 %v2704_v61, %v2454_v60  ;;  %v1075_v15 = vpop.f32.mrb[9].mxu0 }
0x16e8   :  { %v1076_v63 = vadd.f32 %v2454_v60, %v1075_v15 }
0x16e9   :  { %1085 = vst [vmem:[#allocation2 + $0x8] sm:$0xff] %v1081_v62 }
0x16ea   :  { %1084 = vst [vmem:[#allocation2] sm:$0xff] %v1076_v63 }
0x16f1   :  { %v1086_v0 = vld [vmem:[#allocation2] sm:$0x3]  ;;  %v1187_v20 = vld [vmem:[#allocation2 + $0x2] sm:$0x3]  ;;  %v1290_v38 = vld [vmem:[#allocation2 + $0x4] sm:$0x3] }
0x16f2   :  { %v1157_v1 = vadd.f32 %v1153_v12, %v1086_v0  ;;  %v1393_v58 = vld [vmem:[#allocation2 + $0x6] sm:$0x3] }
0x16f4   :  { %3035 = vtanh.f32 %v1157_v1  ;;  %v2457_v3 = vmul.f32 -1.442695, %v1157_v1 }
0x16f6   :  { %3037 = vpow2.f32 %v2457_v3 }
0x16fe   :  { %v3036_v2 = vpop.eup %3035 }
0x16ff   :  { %1167 = vrot.lane.b32.xlu0 %v3036_v2, %s3148_s25 }
0x1700   :  { %v3038_v4 = vpop.eup %3037 }
0x1701   :  { %v1161_v5 = vadd.f32 1.0, %v3038_v4 }
0x1703   :  { %3039 = vrcp.f32 %v1161_v5 }
0x170d   :  { %v3040_v6 = vpop.eup %3039 }
0x170e   :  { %v1165_v10 = vmul.f32 0.0, %v3040_v6 }
0x1771   :  { %v1168_v8 = vpop.permute.xlu0 %1167 }
0x1772   :  { %v1170_v9 = vmul.f32 %v3040_v6, %v1168_v8 }
0x1774   :  { %1172 = vrot.lane.b32.xlu1 %v1170_v9, %s3149_s3 }
0x17e6   :  { %v1173_v13 = vpop.permute.xlu1 %1172 }
0x17e7   :  { %v1175_v14 = vadd.f32 %v1173_v13, %v1165_v10  ;;  %v1496_v13 = vld [vmem:[#allocation2 + $0x8] sm:$0x3] }
0x17e9   :  { %3041 = vtanh.f32 %v1175_v14 }
0x17f3   :  { %v3042_v16 = vpop.eup %3041 }
0x17f4   :  { %1178 = vrot.lane.b32.xlu0 %v3042_v16, %s3148_s25 }
0x1866   :  { %v1179_v17 = vpop.permute.xlu0 %1178 }
0x1867   :  { %v3430_v18 = vmul.f32 %v3040_v6, %v1179_v17 }
0x1869   :  { %1183 = vrot.lane.b32.xlu1 %v3430_v18, %s3149_s3 }
0x18db   :  { %v1184_v19 = vpop.permute.xlu1 %1183 }
0x18dc   :  { %1186 = vst.msk [vmem:[#allocation3] sm:$0x3] %vm263_vm3, %v1184_v19  ;;  %2725 = vmatmul.mubr.msk.f32.vlgmr.msra.gmra.mrb[10].mxu0 %vm160_vm4, %v1184_v19 }
0x18dd   :  { %2913 = vmatpush3.bf16.msra.mxu0 %v3397_v52  ;;  %2746 = vmatprep.mubr.msk.f32.mxu0 %vm3146_vm1, %v3147_v11 }
0x18de   :  { %2914 = vmatprep.subr.bf16.mxu0 %v3145_v7 }
0x18e1   :  { %2916 = vmatpush3.bf16.msra.mxu0 %v3403_v56 }
0x18e2   :  { %2923 = vmatprep.subr.bf16.mxu0 %v3145_v7 }
0x19af   :  { %v1256_v21 = vpop.f32.mrb[10].mxu0 }
0x19b0   :  { %v1260_v22 = vadd.f32 %v1256_v21, %v1187_v20  ;;  %v2726_v23 = vpop.f32.mrb[11].mxu0 }
0x19b2   :  { %3043 = vtanh.f32 %v1260_v22  ;;  %v2459_v25 = vmul.f32 -1.442695, %v1260_v22 }
0x19b4   :  { %3045 = vpow2.f32 %v2459_v25 }
0x19bc   :  { %v3044_v24 = vpop.eup %3043 }
0x19bd   :  { %1270 = vrot.lane.b32.xlu0 %v3044_v24, %s3148_s25 }
0x19be   :  { %v3046_v26 = vpop.eup %3045 }
0x19bf   :  { %v1264_v27 = vadd.f32 1.0, %v3046_v26 }
0x19c1   :  { %3047 = vrcp.f32 %v1264_v27 }
0x19cb   :  { %v3048_v28 = vpop.eup %3047 }
0x19cc   :  { %v1268_v31 = vmul.f32 %v3048_v28, %v1175_v14 }
0x1a2f   :  { %v1271_v29 = vpop.permute.xlu0 %1270 }
0x1a30   :  { %v1273_v30 = vmul.f32 %v3048_v28, %v1271_v29 }
0x1a32   :  { %1275 = vrot.lane.b32.xlu1 %v1273_v30, %s3149_s3 }
0x1aa4   :  { %v1276_v32 = vpop.permute.xlu1 %1275 }
0x1aa5   :  { %v1278_v33 = vadd.f32 %v1276_v32, %v1268_v31 }
0x1aa7   :  { %3049 = vtanh.f32 %v1278_v33 }
0x1ab1   :  { %v3050_v34 = vpop.eup %3049 }
0x1ab2   :  { %1281 = vrot.lane.b32.xlu0 %v3050_v34, %s3148_s25 }
0x1b24   :  { %v1282_v35 = vpop.permute.xlu0 %1281 }
0x1b25   :  { %v3445_v36 = vmul.f32 %v3048_v28, %v1282_v35 }
0x1b27   :  { %1286 = vrot.lane.b32.xlu1 %v3445_v36, %s3149_s3 }
0x1b99   :  { %v1287_v37 = vpop.permute.xlu1 %1286 }
0x1b9a   :  { %1289 = vst.msk [vmem:[#allocation3 + $0x2] sm:$0x3] %vm263_vm3, %v1287_v37  ;;  %2736 = vmatmul.mubr.msk.f32.vlgmr.msra.gmra.mrb[12].mxu1 %vm160_vm4, %v1287_v37 }
0x1b9b   :  { %2919 = vmatpush3.bf16.msra.mxu1 %v3397_v52  ;;  %2757 = vmatprep.mubr.msk.f32.mxu1 %vm3146_vm1, %v3147_v11 }
0x1b9c   :  { %2920 = vmatprep.subr.bf16.mxu1 %v3145_v7 }
0x1b9f   :  { %2922 = vmatpush3.bf16.msra.mxu1 %v3403_v56 }
0x1ba0   :  { %2929 = vmatprep.subr.bf16.mxu1 %v3145_v7 }
0x1c6d   :  { %v1359_v39 = vpop.f32.mrb[12].mxu1 }
0x1c6e   :  { %v1363_v40 = vadd.f32 %v1359_v39, %v1290_v38  ;;  %v2737_v41 = vpop.f32.mrb[13].mxu1 }
0x1c70   :  { %3051 = vtanh.f32 %v1363_v40  ;;  %v2461_v43 = vmul.f32 -1.442695, %v1363_v40 }
0x1c72   :  { %3053 = vpow2.f32 %v2461_v43 }
0x1c7a   :  { %v3052_v42 = vpop.eup %3051 }
0x1c7b   :  { %1373 = vrot.lane.b32.xlu0 %v3052_v42, %s3148_s25 }
0x1c7c   :  { %v3054_v44 = vpop.eup %3053 }
0x1c7d   :  { %v1367_v45 = vadd.f32 1.0, %v3054_v44 }
0x1c7f   :  { %3055 = vrcp.f32 %v1367_v45 }
0x1c89   :  { %v3056_v46 = vpop.eup %3055 }
0x1c8a   :  { %v1371_v49 = vmul.f32 %v3056_v46, %v1278_v33  ;;  %v1599_v33 = vld [vmem:[#allocation2 + $0xa] sm:$0x3] }
0x1ced   :  { %v1374_v47 = vpop.permute.xlu0 %1373 }
0x1cee   :  { %v1376_v48 = vmul.f32 %v3056_v46, %v1374_v47 }
0x1cf0   :  { %1378 = vrot.lane.b32.xlu1 %v1376_v48, %s3149_s3 }
0x1d62   :  { %v1379_v50 = vpop.permute.xlu1 %1378 }
0x1d63   :  { %v1381_v51 = vadd.f32 %v1379_v50, %v1371_v49 }
0x1d65   :  { %3057 = vtanh.f32 %v1381_v51 }
0x1d6f   :  { %v3058_v53 = vpop.eup %3057 }
0x1d70   :  { %1384 = vrot.lane.b32.xlu0 %v3058_v53, %s3148_s25 }
0x1de2   :  { %v1385_v54 = vpop.permute.xlu0 %1384 }
0x1de3   :  { %v3460_v55 = vmul.f32 %v3056_v46, %v1385_v54 }
0x1de5   :  { %1389 = vrot.lane.b32.xlu1 %v3460_v55, %s3149_s3 }
0x1e57   :  { %v1390_v57 = vpop.permute.xlu1 %1389 }
0x1e58   :  { %1392 = vst.msk [vmem:[#allocation3 + $0x4] sm:$0x3] %vm263_vm3, %v1390_v57  ;;  %2747 = vmatmul.mubr.msk.f32.vlgmr.msra.gmra.mrb[12].mxu0 %vm160_vm4, %v1390_v57 }
0x1e59   :  { %2925 = vmatpush3.bf16.msra.mxu0 %v3397_v52  ;;  %2768 = vmatprep.mubr.msk.f32.mxu0 %vm3146_vm1, %v3147_v11 }
0x1e5a   :  { %2926 = vmatprep.subr.bf16.mxu0 %v3145_v7 }
0x1e5d   :  { %2928 = vmatpush3.bf16.msra.mxu0 %v3403_v56 }
0x1e5e   :  { %2935 = vmatprep.subr.bf16.mxu0 %v3145_v7 }
0x1f2b   :  { %v1462_v12 = vpop.f32.mrb[12].mxu0 }
0x1f2c   :  { %v1466_v59 = vadd.f32 %v1462_v12, %v1393_v58  ;;  %v2748_v60 = vpop.f32.mrb[13].mxu0 }
0x1f2e   :  { %3059 = vtanh.f32 %v1466_v59  ;;  %v2463_v62 = vmul.f32 -1.442695, %v1466_v59 }
0x1f30   :  { %3061 = vpow2.f32 %v2463_v62 }
0x1f38   :  { %v3060_v61 = vpop.eup %3059 }
0x1f39   :  { %1476 = vrot.lane.b32.xlu0 %v3060_v61, %s3148_s25 }
0x1f3a   :  { %v3062_v15 = vpop.eup %3061 }
0x1f3b   :  { %v1470_v63 = vadd.f32 1.0, %v3062_v15 }
0x1f3d   :  { %3063 = vrcp.f32 %v1470_v63 }
0x1f47   :  { %v3064_v0 = vpop.eup %3063 }
0x1f48   :  { %v1474_v3 = vmul.f32 %v3064_v0, %v1381_v51  ;;  %v1702_v51 = vld [vmem:[#allocation2 + $0xc] sm:$0x3] }
0x1fab   :  { %v1477_v1 = vpop.permute.xlu0 %1476 }
0x1fac   :  { %v1479_v2 = vmul.f32 %v3064_v0, %v1477_v1 }
0x1fae   :  { %1481 = vrot.lane.b32.xlu1 %v1479_v2, %s3149_s3 }
0x2020   :  { %v1482_v4 = vpop.permute.xlu1 %1481 }
0x2021   :  { %v1484_v5 = vadd.f32 %v1482_v4, %v1474_v3 }
0x2023   :  { %3065 = vtanh.f32 %v1484_v5 }
0x202d   :  { %v3066_v6 = vpop.eup %3065 }
0x202e   :  { %1487 = vrot.lane.b32.xlu0 %v3066_v6, %s3148_s25  ;;  %v1805_v6 = vld [vmem:[#allocation2 + $0xe] sm:$0x3] }
0x20a0   :  { %v1488_v8 = vpop.permute.xlu0 %1487 }
0x20a1   :  { %v3475_v9 = vmul.f32 %v3064_v0, %v1488_v8 }
0x20a3   :  { %1492 = vrot.lane.b32.xlu1 %v3475_v9, %s3149_s3 }
0x2115   :  { %v1493_v10 = vpop.permute.xlu1 %1492 }
0x2116   :  { %1495 = vst.msk [vmem:[#allocation3 + $0x6] sm:$0x3] %vm263_vm3, %v1493_v10  ;;  %2758 = vmatmul.mubr.msk.f32.vlgmr.msra.gmra.mrb[14].mxu1 %vm160_vm4, %v1493_v10 }
0x2117   :  { %2931 = vmatpush3.bf16.msra.mxu1 %v3397_v52  ;;  %2779 = vmatprep.mubr.msk.f32.mxu1 %vm3146_vm1, %v3147_v11 }
0x2118   :  { %2932 = vmatprep.subr.bf16.mxu1 %v3145_v7 }
0x211b   :  { %2934 = vmatpush3.bf16.msra.mxu1 %v3403_v56 }
0x211d   :  { %v1908_v50 = vld [vmem:[#allocation3] sm:$0xff] }
0x21e9   :  { %v1565_v14 = vpop.f32.mrb[14].mxu1 }
0x21ea   :  { %v1569_v16 = vadd.f32 %v1565_v14, %v1496_v13  ;;  %v2759_v17 = vpop.f32.mrb[15].mxu1 }
0x21ec   :  { %3067 = vtanh.f32 %v1569_v16  ;;  %v2465_v20 = vmul.f32 -1.442695, %v1569_v16 }
0x21ee   :  { %3069 = vpow2.f32 %v2465_v20 }
0x21f6   :  { %v3068_v19 = vpop.eup %3067 }
0x21f7   :  { %1579 = vrot.lane.b32.xlu0 %v3068_v19, %s3148_s25 }
0x21f8   :  { %v3070_v21 = vpop.eup %3069 }
0x21f9   :  { %v1573_v22 = vadd.f32 1.0, %v3070_v21 }
0x21fb   :  { %3071 = vrcp.f32 %v1573_v22 }
0x2205   :  { %v3072_v23 = vpop.eup %3071 }
0x2206   :  { %v1577_v26 = vmul.f32 %v3072_v23, %v1484_v5 }
0x2269   :  { %v1580_v24 = vpop.permute.xlu0 %1579 }
0x226a   :  { %v1582_v25 = vmul.f32 %v3072_v23, %v1580_v24 }
0x226c   :  { %1584 = vrot.lane.b32.xlu1 %v1582_v25, %s3149_s3 }
0x22de   :  { %v1585_v27 = vpop.permute.xlu1 %1584 }
0x22df   :  { %v1587_v28 = vadd.f32 %v1585_v27, %v1577_v26  ;;  %v1910_v27 = vld [vmem:[%s3612_s7] sm:$0xff] }
0x22e1   :  { %3073 = vtanh.f32 %v1587_v28 }
0x22eb   :  { %v3074_v29 = vpop.eup %3073 }
0x22ec   :  { %1590 = vrot.lane.b32.xlu0 %v3074_v29, %s3148_s25 }
0x235e   :  { %v1591_v30 = vpop.permute.xlu0 %1590 }
0x235f   :  { %v3489_v31 = vmul.f32 %v3072_v23, %v1591_v30  ;;  %v1912_v30 = vld [vmem:[%s3612_s7 + $0x10] sm:$0xff] }
0x2361   :  { %1595 = vrot.lane.b32.xlu1 %v3489_v31, %s3149_s3 }
0x23d3   :  { %v1596_v32 = vpop.permute.xlu1 %1595 }
0x23d4   :  { %1598 = vst.msk [vmem:[#allocation3 + $0x8] sm:$0x3] %vm263_vm3, %v1596_v32  ;;  %2769 = vmatmul.mubr.msk.f32.vlgmr.msra.gmra.mrb[14].mxu0 %vm160_vm4, %v1596_v32  ;;  %v1913_v32 = vld [vmem:[%s3612_s7 + $0x18] sm:$0xff] }
0x23d5   :  { %2937 = vmatpush3.bf16.msra.mxu0 %v3397_v52  ;;  %2790 = vmatprep.mubr.msk.f32.mxu0 %vm3146_vm1, %v3147_v11 }
0x23d6   :  { %2938 = vmatprep.subr.bf16.mxu0 %v3145_v7 }
0x23d9   :  { %2940 = vmatpush3.bf16.msra.mxu0 %v3403_v56 }
0x24a7   :  { %v1668_v34 = vpop.f32.mrb[14].mxu0 }
0x24a8   :  { %v1672_v35 = vadd.f32 %v1668_v34, %v1599_v33  ;;  %v2770_v37 = vpop.f32.mrb[15].mxu0  ;;  %v2945_v33 = vpack.c.bf16 %v1913_v32, %v1912_v30 }
0x24aa   :  { %3075 = vtanh.f32 %v1672_v35  ;;  %v2467_v39 = vmul.f32 -1.442695, %v1672_v35 }
0x24ac   :  { %3077 = vpow2.f32 %v2467_v39  ;;  %v2004_v39 = vld [vmem:[%s3614_s9] sm:$0xff] }
0x24b4   :  { %v3076_v38 = vpop.eup %3075 }
0x24b5   :  { %1682 = vrot.lane.b32.xlu0 %v3076_v38, %s3148_s25 }
0x24b6   :  { %v3078_v40 = vpop.eup %3077 }
0x24b7   :  { %v1676_v41 = vadd.f32 1.0, %v3078_v40  ;;  %v2005_v40 = vld [vmem:[%s3614_s9 + $0x8] sm:$0xff] }
0x24b9   :  { %3079 = vrcp.f32 %v1676_v41  ;;  %v2949_v41 = vpack.c.bf16 %v2005_v40, %v2004_v39 }
0x24bb   :  { %2950 = vmatprep.subr.bf16.mxu0 %v2949_v41 }
0x24c3   :  { %v3080_v52 = vpop.eup %3079 }
0x24c4   :  { %v1680_v44 = vmul.f32 %v3080_v52, %v1587_v28  ;;  %v1911_v28 = vld [vmem:[%s3612_s7 + $0x8] sm:$0xff] }
0x24c5   :  { %v2941_v29 = vpack.c.bf16 %v1911_v28, %v1910_v27 }
0x24c7   :  { %2942 = vmatprep.subr.bf16.mxu1 %v2941_v29 }
0x2527   :  { %v1683_v42 = vpop.permute.xlu0 %1682 }
0x2528   :  { %v1685_v43 = vmul.f32 %v3080_v52, %v1683_v42 }
0x252a   :  { %1687 = vrot.lane.b32.xlu1 %v1685_v43, %s3149_s3 }
0x259c   :  { %v1688_v56 = vpop.permute.xlu1 %1687 }
0x259d   :  { %v1690_v45 = vadd.f32 %v1688_v56, %v1680_v44 }
0x259f   :  { %3081 = vtanh.f32 %v1690_v45 }
0x25a9   :  { %v3082_v46 = vpop.eup %3081 }
0x25aa   :  { %1693 = vrot.lane.b32.xlu0 %v3082_v46, %s3148_s25 }
0x261c   :  { %v1694_v47 = vpop.permute.xlu0 %1693 }
0x261d   :  { %v3503_v48 = vmul.f32 %v3080_v52, %v1694_v47  ;;  %v2472_v52 = vld [vmem:[%s3613_s8] ss:$0 sm:$0xff]  ;;  %v3150_v47 = vmov 0  }
0x261e   :  { %2969 = vset.pattern.permute.xlu1 %v3150_v47  ;;  %2970 = vset.pattern.permute.xlu0 %v3150_v47 }
0x261f   :  { %1698 = vrot.lane.b32.xlu1 %v3503_v48, %s3149_s3 }
0x2691   :  { %v1699_v49 = vpop.permute.xlu1 %1698 }
0x2692   :  { %1701 = vst.msk [vmem:[#allocation3 + $0xa] sm:$0x3] %vm263_vm3, %v1699_v49  ;;  %2780 = vmatmul.mubr.msk.f32.vlgmr.msra.gmra.mrb[16].mxu1 %vm160_vm4, %v1699_v49  ;;  %v2475_v49 = vld [vmem:[#allocation4] ss:$0 sm:$0xff] }
0x2693   :  { %2801 = vmatprep.mubr.msk.f32.mxu1 %vm160_vm4, %v1908_v50  ;;  %2944 = vmatpush3.bf16.msra.mxu1 %v2941_v29 }
0x2694   :  { %2946 = vmatprep.subr.bf16.mxu1 %v2945_v33 }
0x2697   :  { %2948 = vmatpush3.bf16.msra.mxu1 %v2945_v33 }
0x2698   :  { %2959 = vmatprep.subr.bf16.mxu1 %v3145_v7 }
0x2765   :  { %v1771_v53 = vpop.f32.mrb[16].mxu1 }
0x2766   :  { %v1775_v54 = vadd.f32 %v1771_v53, %v1702_v51  ;;  %v2781_v57 = vpop.f32.mrb[17].mxu1 }
0x2768   :  { %3083 = vtanh.f32 %v1775_v54  ;;  %v2469_v12 = vmul.f32 -1.442695, %v1775_v54 }
0x276a   :  { %3085 = vpow2.f32 %v2469_v12 }
0x2772   :  { %v3084_v58 = vpop.eup %3083 }
0x2773   :  { %1785 = vrot.lane.b32.xlu0 %v3084_v58, %s3148_s25 }
0x2774   :  { %v3086_v59 = vpop.eup %3085 }
0x2775   :  { %v1779_v60 = vadd.f32 1.0, %v3086_v59 }
0x2777   :  { %3087 = vrcp.f32 %v1779_v60 }
0x2781   :  { %v3088_v61 = vpop.eup %3087 }
0x2782   :  { %v1783_v63 = vmul.f32 %v3088_v61, %v1690_v45 }
0x27e5   :  { %v1786_v62 = vpop.permute.xlu0 %1785 }
0x27e6   :  { %v1788_v15 = vmul.f32 %v3088_v61, %v1786_v62 }
0x27e8   :  { %1790 = vrot.lane.b32.xlu1 %v1788_v15, %s3149_s3 }
0x285a   :  { %v1791_v0 = vpop.permute.xlu1 %1790 }
0x285b   :  { %v1793_v1 = vadd.f32 %v1791_v0, %v1783_v63 }
0x285d   :  { %3089 = vtanh.f32 %v1793_v1 }
0x2867   :  { %v3090_v2 = vpop.eup %3089 }
0x2868   :  { %1796 = vrot.lane.b32.xlu0 %v3090_v2, %s3148_s25 }
0x28da   :  { %v1797_v3 = vpop.permute.xlu0 %1796 }
0x28db   :  { %v3513_v4 = vmul.f32 %v3088_v61, %v1797_v3 }
0x28dd   :  { %1801 = vrot.lane.b32.xlu1 %v3513_v4, %s3149_s3 }
0x294f   :  { %v1802_v5 = vpop.permute.xlu1 %1801 }
0x2950   :  { %1804 = vst.msk [vmem:[#allocation3 + $0xc] sm:$0x3] %vm263_vm3, %v1802_v5  ;;  %2791 = vmatmul.mubr.msk.f32.vlgmr.msra.gmra.mrb[16].mxu0 %vm160_vm4, %v1802_v5 }
0x2951   :  { %2952 = vmatpush3.bf16.msra.mxu0 %v2949_v41 }
0x2952   :  { %2953 = vmatprep.subr.bf16.mxu0 %v3145_v7 }
0x2a23   :  { %v1874_v8 = vpop.f32.mrb[16].mxu0 }
0x2a24   :  { %v1878_v10 = vadd.f32 %v1874_v8, %v1805_v6  ;;  %v2792_v13 = vpop.f32.mrb[17].mxu0 }
0x2a26   :  { %3091 = vtanh.f32 %v1878_v10  ;;  %v2471_v16 = vmul.f32 -1.442695, %v1878_v10 }
0x2a28   :  { %3093 = vpow2.f32 %v2471_v16 }
0x2a30   :  { %v3092_v14 = vpop.eup %3091 }
0x2a31   :  { %1888 = vrot.lane.b32.xlu0 %v3092_v14, %s3148_s25 }
0x2a32   :  { %v3094_v17 = vpop.eup %3093 }
0x2a33   :  { %v1882_v19 = vadd.f32 1.0, %v3094_v17 }
0x2a35   :  { %3095 = vrcp.f32 %v1882_v19 }
0x2a3f   :  { %v3096_v20 = vpop.eup %3095 }
0x2a40   :  { %v1886_v23 = vmul.f32 %v3096_v20, %v1793_v1 }
0x2aa3   :  { %v1889_v21 = vpop.permute.xlu0 %1888 }
0x2aa4   :  { %v1891_v22 = vmul.f32 %v3096_v20, %v1889_v21 }
0x2aa6   :  { %1893 = vrot.lane.b32.xlu1 %v1891_v22, %s3149_s3 }
0x2b18   :  { %v1894_v24 = vpop.permute.xlu1 %1893 }
0x2b19   :  { %v1896_v25 = vadd.f32 %v1894_v24, %v1886_v23 }
0x2b1b   :  { %3097 = vtanh.f32 %v1896_v25 }
0x2b25   :  { %v3098_v26 = vpop.eup %3097 }
0x2b26   :  { %1899 = vrot.lane.b32.xlu0 %v3098_v26, %s3148_s25 }
0x2b98   :  { %v1900_v34 = vpop.permute.xlu0 %1899 }
0x2b99   :  { %v3535_v35 = vmul.f32 %v3096_v20, %v1900_v34 }
0x2b9b   :  { %1904 = vrot.lane.b32.xlu1 %v3535_v35, %s3149_s3 }
0x2c0d   :  { %v1905_v37 = vpop.permute.xlu1 %1904 }
0x2c0e   :  { %1907 = vst.msk [vmem:[#allocation3 + $0xe] sm:$0x3] %vm263_vm3, %v1905_v37 }
0x2c15   :  { %v1909_v38 = vld [vmem:[#allocation3 + $0x8] sm:$0xff] }
0x2c16   :  { %2802 = vmatmul.mubr.msk.f32.vlgmr.msra.gmra.mrb[18].mxu1 %vm160_vm4, %v1909_v38 }
0x2c17   :  { %2826 = vmatprep.mubr.msk.f32.mxu1 %vm3146_vm1, %v3147_v11 }
0x2ce9   :  { %v2803_v42 = vpop.f32.mrb[18].mxu1 }
0x2cea   :  { %v1999_v43 = vadd.f32 %v2803_v42, %v2472_v52  ;;  %v1993_v44 = vpop.f32.mrb[19].mxu1 }
0x2ceb   :  { %v1994_v56 = vadd.f32 %v2472_v52, %v1993_v44 }
0x2ced   :  { %3099 = vtanh.f32 %v1994_v56 }
0x2cee   :  { %3101 = vtanh.f32 %v1999_v43 }
0x2cf7   :  { %v3100_v45 = vpop.eup %3099 }
0x2cf8   :  { %v3102_v46 = vpop.eup %3101  ;;  %2808 = vmatprep.mubr.msk.f32.mxu0 %vm2013_vm5, %v3100_v45 }
0x2cf9   :  { %2809 = vmatmul.mubr.msk.f32.vlgmr.msra.gmra.mrb[18].mxu0 %vm2013_vm5, %v3102_v46 }
0x2cfa   :  { %2819 = vmatprep.mubr.msk.f32.mxu0 %vm3146_vm1, %v3147_v11 }
0x2dcc   :  { %v2810_v50 = vpop.f32.mrb[18].mxu0 }
0x2dcd   :  { %v2086_v51 = vpop.f32.mrb[19].mxu0  ;;  %v2092_v12 = vadd.f32 %v2810_v50, %v2475_v49 }
0x2dce   :  { %v2087_v53 = vadd.f32 %v2475_v49, %v2086_v51 }
0x2dcf   :  { %v2107_v62 = vrot.slane %v2092_v12, 2  ;;  %v2110_v0 = vrot.slane %v2092_v12, 4  ;;  %v2113_v11 = vrot.slane %v2092_v12, 6 }
0x2dd0   :  { %v2096_v54 = vrot.slane %v2087_v53, 2  ;;  %v2099_v58 = vrot.slane %v2087_v53, 4  ;;  %v2102_v60 = vrot.slane %v2087_v53, 6 }
0x2dd2   :  { %v2098_v57 = vmax.f32 %v2087_v53, %v2096_v54 }
0x2dd4   :  { %v2101_v59 = vmax.f32 %v2098_v57, %v2099_v58 }
0x2dd6   :  { %v2104_v61 = vmax.f32 %v2101_v59, %v2102_v60 }
0x2dd8   :  { %v2105_v15 = vmax.f32 %v2104_v61, %v2092_v12 }
0x2dda   :  { %v2109_v63 = vmax.f32 %v2105_v15, %v2107_v62 }
0x2ddc   :  { %v2112_v1 = vmax.f32 %v2109_v63, %v2110_v0 }
0x2dde   :  { %v2115_v2 = vmax.f32 %v2112_v1, %v2113_v11  ;;  %v2250_v1 = vld [vmem:[%s3616_s11] sm:$0xff]  ;;  %v2251_v11 = vld [vmem:[%s3616_s11 + $0x8] sm:$0xff] }
0x2de0   :  { %v2116_v3 = vsub.f32 %v2087_v53, %v2115_v2  ;;  %v2120_v5 = vrot.slane %v2115_v2, 6  ;;  %v2125_v6 = vrot.slane %v2115_v2, 4  ;;  %v2130_v8 = vrot.slane %v2115_v2, 2 }
0x2de1   :  { %v2135_v10 = vsub.f32 %v2092_v12, %v2115_v2  ;;  %v2252_v2 = vld [vmem:[%s3616_s11 + $0x10] sm:$0xff] }
0x2de2   :  { %v2117_v13 = vmul.f32 1.442695, %v2116_v3  ;;  %v2122_v14 = vsub.f32 %v2087_v53, %v2120_v5  ;;  %v2127_v16 = vsub.f32 %v2087_v53, %v2125_v6  ;;  %v2132_v17 = vsub.f32 %v2087_v53, %v2130_v8 }
0x2de3   :  { %v2138_v19 = vsub.f32 %v2092_v12, %v2120_v5  ;;  %v2141_v20 = vsub.f32 %v2092_v12, %v2125_v6  ;;  %v2144_v21 = vsub.f32 %v2092_v12, %v2130_v8  ;;  %v2136_v26 = vmul.f32 1.442695, %v2135_v10  ;;  %v2253_v5 = vld [vmem:[%s3616_s11 + $0x18] sm:$0xff] }
0x2de4   :  { %v2123_v22 = vmul.f32 1.442695, %v2122_v14  ;;  %v2128_v23 = vmul.f32 1.442695, %v2127_v16  ;;  %v2133_v24 = vmul.f32 1.442695, %v2132_v17  ;;  %3103 = vpow2.f32 %v2117_v13 }
0x2de5   :  { %v2139_v25 = vmul.f32 1.442695, %v2138_v19  ;;  %v2142_v27 = vmul.f32 1.442695, %v2141_v20  ;;  %v2145_v28 = vmul.f32 1.442695, %v2144_v21  ;;  %v2954_v3 = vpack.c.bf16 %v2251_v11, %v2250_v1 }
0x2de6   :  { %3105 = vpow2.f32 %v2123_v22  ;;  %v2957_v6 = vpack.c.bf16 %v2253_v5, %v2252_v2 }
0x2de7   :  { %3107 = vpow2.f32 %v2128_v23  ;;  %2955 = vmatpush3.bf16.msra.mxu0 %v2954_v3 }
0x2de8   :  { %3109 = vpow2.f32 %v2133_v24  ;;  %2956 = vmatprep.subr.bf16.mxu0 %v3145_v7 }
0x2de9   :  { %3111 = vpow2.f32 %v2139_v25 }
0x2dea   :  { %3113 = vpow2.f32 %v2136_v26 }
0x2deb   :  { %3115 = vpow2.f32 %v2142_v27  ;;  %2958 = vmatpush3.bf16.msra.mxu0 %v2957_v6 }
0x2dec   :  { %3117 = vpow2.f32 %v2145_v28 }
0x2dee   :  { %v3104_v29 = vpop.eup %3103 }
0x2df0   :  { %v3106_v30 = vpop.eup %3105 }
0x2df1   :  { %v3108_v32 = vpop.eup %3107  ;;  %v2148_v33 = vrot.slane %v3106_v30, 2 }
0x2df2   :  { %v3110_v34 = vpop.eup %3109  ;;  %v2152_v38 = vrot.slane %v3108_v32, 4 }
0x2df3   :  { %v2150_v37 = vadd.f32 %v3104_v29, %v2148_v33  ;;  %v2156_v40 = vrot.slane %v3110_v34, 6  ;;  %v3112_v41 = vpop.eup %3111 }
0x2df4   :  { %v3114_v52 = vpop.eup %3113  ;;  %v2161_v56 = vrot.slane %v3112_v41, 2 }
0x2df5   :  { %v2154_v39 = vadd.f32 %v2152_v38, %v2150_v37  ;;  %v3116_v43 = vpop.eup %3115 }
0x2df6   :  { %v3118_v45 = vpop.eup %3117  ;;  %v2165_v47 = vrot.slane %v3116_v43, 4 }
0x2df7   :  { %v2158_v42 = vadd.f32 %v2156_v40, %v2154_v39  ;;  %v2169_v50 = vrot.slane %v3118_v45, 6 }
0x2df9   :  { %v2159_v44 = vadd.f32 %v3114_v52, %v2158_v42 }
0x2dfb   :  { %v2163_v46 = vadd.f32 %v2161_v56, %v2159_v44  ;;  %v2480_v44 = vld [vmem:[%s3619_s14] ss:$0 sm:$0xff] }
0x2dfd   :  { %v2167_v49 = vadd.f32 %v2165_v47, %v2163_v46 }
0x2dff   :  { %v2171_v51 = vadd.f32 %v2169_v50, %v2167_v49 }
0x2e01   :  { %3119 = vrcp.f32 %v2171_v51 }
0x2e0b   :  { %v3120_v53 = vpop.eup %3119 }
0x2e0c   :  { %v2174_v54 = vmul.f32 %v3120_v53, %v3104_v29  ;;  %v2182_v57 = vrot.slane %v3120_v53, 6  ;;  %v2193_v58 = vrot.slane %v3120_v53, 4  ;;  %v2204_v12 = vrot.slane %v3120_v53, 2 }
0x2e0d   :  { %v2215_v59 = vmul.f32 %v3120_v53, %v3114_v52 }
0x2e0e   :  { %2177 = vperm.xlu1 %2969, %v2174_v54   ;;  %v2184_v60 = vmul.f32 %v3106_v30, %v2182_v57  ;;  %v2195_v61 = vmul.f32 %v3108_v32, %v2193_v58  ;;  %v2206_v62 = vmul.f32 %v3110_v34, %v2204_v12  ;;  %v2223_v15 = vmul.f32 %v3112_v41, %v2182_v57 }
0x2e0f   :  { %v2232_v63 = vmul.f32 %v3116_v43, %v2193_v58  ;;  %v2241_v0 = vmul.f32 %v3118_v45, %v2204_v12 }
0x2e10   :  { %2187 = vperm.xlu0 %2970, %v2184_v60  }
0x2e12   :  { %2198 = vperm.xlu1 %2969, %v2195_v61  }
0x2e14   :  { %2209 = vperm.xlu0 %2970, %v2206_v62  }
0x2e16   :  { %2218 = vperm.xlu1 %2969, %v2215_v59  }
0x2e18   :  { %2226 = vperm.xlu0 %2970, %v2223_v15  }
0x2e1a   :  { %2235 = vperm.xlu1 %2969, %v2232_v63  }
0x2e1c   :  { %2244 = vperm.xlu0 %2970, %v2241_v0  }
0x2e8d   :  { %v2178_v8 = vpop.permute.xlu1 %2177 }
0x2e8e   :  { %v2180_v16 = vmul.f32 %v2178_v8, %v3430_v18 }
0x2e8f   :  { %v2188_v10 = vpop.permute.xlu0 %2187 }
0x2e90   :  { %v2189_v13 = vrot.slane %v2188_v10, 2 }
0x2e91   :  { %v2199_v14 = vpop.permute.xlu1 %2198 }
0x2e92   :  { %v2191_v17 = vmul.f32 %v2189_v13, %v3445_v36  ;;  %v2200_v19 = vrot.slane %v2199_v14, 4 }
0x2e93   :  { %v2210_v20 = vpop.permute.xlu0 %2209 }
0x2e94   :  { %v2192_v21 = vadd.f32 %v2191_v17, %v2180_v16  ;;  %v2202_v22 = vmul.f32 %v2200_v19, %v3460_v55  ;;  %v2211_v23 = vrot.slane %v2210_v20, 6 }
0x2e95   :  { %v2219_v24 = vpop.permute.xlu1 %2218 }
0x2e96   :  { %v2203_v25 = vadd.f32 %v2202_v22, %v2192_v21  ;;  %v2213_v26 = vmul.f32 %v2211_v23, %v3475_v9  ;;  %v2221_v28 = vmul.f32 %v2219_v24, %v3489_v31  ;;  %v2337_v31 = vld [vmem:[%s3618_s13] sm:$0xff] }
0x2e97   :  { %v2227_v7 = vpop.permute.xlu0 %2226 }
0x2e98   :  { %v2214_v27 = vadd.f32 %v2213_v26, %v2203_v25  ;;  %v2228_v29 = vrot.slane %v2227_v7, 2 }
0x2e99   :  { %v2236_v30 = vpop.permute.xlu1 %2235 }
0x2e9a   :  { %v2222_v32 = vadd.f32 %v2221_v28, %v2214_v27  ;;  %v2230_v18 = vmul.f32 %v2228_v29, %v3503_v48  ;;  %v2237_v36 = vrot.slane %v2236_v30, 4  ;;  %v2338_v48 = vld [vmem:[%s3618_s13 + $0x8] sm:$0xff]  ;;  %s3121_s13 = scalar_lea.vmem %s2428_s27, 32 }
0x2e9b   :  { %v2245_v33 = vpop.permute.xlu0 %2244  ;;  %v2960_v41 = vpack.c.bf16 %v2338_v48, %v2337_v31  ;;  %p3122_p0 = scmp.ne.s32.totalorder %s2428_s27, %s3121_s13  ;;  %p3127_p2 = scmp.lt.s32.totalorder %s3121_s13, %s3121_s13 }
0x2e9c   :  { %v2231_v34 = vadd.f32 %v2230_v18, %v2222_v32  ;;  %v2239_v37 = vmul.f32 %v2237_v36, %v3513_v4  ;;  %v2246_v55 = vrot.slane %v2245_v33, 6  ;;  %v2478_v4 = vld [vmem:[%s3617_s12] ss:$0 sm:$0xff] }
0x2e9d   :  { %2961 = vmatpush3.bf16.msra.mxu1 %v2960_v41  ;;  %p3128_p3 = por %p3127_p2, %p3126_p1 }
0x2e9e   :  { %v2240_v38 = vadd.f32 %v2239_v37, %v2231_v34  ;;  %v2248_v39 = vmul.f32 %v2246_v55, %v3535_v35 }
0x2e9f   :  { %p3129_p4 = pnand %p3128_p3, %p3122_p0 }
0x2ea0   :  { %v2249_v40 = vadd.f32 %v2248_v39, %v2240_v38 }
0x2ea2   :  { %2262 = vrot.lane.b32.xlu1 %v2249_v40, %s3149_s3 }
0x2f14   :  { %v2263_v9 = vpop.permute.xlu1 %2262 }
0x2f15   :  { %2820 = vmatmul.mubr.msk.f32.vlgmr.msra.gmra.mrb[20].mxu0 %vm160_vm4, %v2263_v9 }
0x2fe8   :  { %v2332_v35 = vpop.f32.mrb[20].mxu0 }
0x2fe9   :  { %v2333_v52 = vadd.f32 %v2478_v4, %v2332_v35  ;;  %v2821_v42 = vpop.f32.mrb[21].mxu0 }
0x2feb   :  { %v2336_v43 = vmax.f32 %v2333_v52, 0.0 }
0x2fed   :  { %2827 = vmatmul.mubr.msk.f32.vlgmr.msra.gmra.mrb[20].mxu1 %vm2013_vm5, %v2336_v43 }
0x30c0   :  { %v2415_v56 = vpop.f32.mrb[20].mxu1 }
0x30c1   :  { %v2416_v45 = vadd.f32 %v2480_v44, %v2415_v56  ;;  %v2828_v46 = vpop.f32.mrb[21].mxu1 }
0x30c3   :  { %2420 = vst.msk [vmem:[#allocation5] sm:$0x3] %vm2419_vm6, %v2416_v45 }
0x30c4   :  { %3132 = shalt.err (!%p3129_p4)
}
0x30c5   :  { %s3133_s28 = scalar_lea.hbm %s3620_s15, 32 }
0x30c6   :  { %p3134_p5 = scmp.ne.s32.totalorder %s3620_s15, %s3133_s28  ;;  %p3137_p6 = scmp.lt.u32.totalorder %s3133_s28, %s3620_s15 }
0x30c8   :  { %p3139_p7 = pnand %p3137_p6, %p3134_p5 }
0x30ca   :  { %3142 = shalt.err (!%p3139_p7)
}
0x30cb   :  { %2430 = dma.vmem_to_hbm [thread:$0]  %s2428_s27, 32, %s3620_s15, [#allocation6]  }
0x30cc   :  { %3143 = dma.done.wait [#allocation6], 32  }
0x30cd   :  { %3144 = vsyncadd [#allocation6], 4294967264 }
0x30ce   :  { %2434 = vsyncpa [#allocation6], 1 }

</bundles_post_ra>
